<compile_context>
chip_gen: v6e
topology: v6e:2x2x1
jax: 0.10.0
libtpu: 0.0.40
codegen_flags: <defaults>
</compile_context>

<pallas_src>
import functools

import numpy as np
import jax
import jax.numpy as jnp
from jax.experimental import pallas as pl
from jax.experimental.pallas import tpu as pltpu


_RADII = [3, 4, 6, 8, 10]
_ALIAS_BLUR = [0.1, 0.5, 0.5, 0.5, 0.5]


# ----------------------------------------------------------------------------
# Host-side constant construction (cv2 semantics reproduced in numpy, cached).
# ----------------------------------------------------------------------------
def _reflect101_np(idx, n):
    """cv2 BORDER_REFLECT_101 index map (handles repeated reflection)."""
    idx = np.asarray(idx)
    if n == 1:
        return np.zeros_like(idx)
    period = 2 * (n - 1)
    idx = np.mod(idx, period)
    return np.where(idx >= n, period - idx, idx)


def _pad_reflect101_np(img, rh, rw):
    h, w = img.shape
    ri = _reflect101_np(np.arange(h + 2 * rh) - rh, h)
    ci = _reflect101_np(np.arange(w + 2 * rw) - rw, w)
    return img[np.ix_(ri, ci)]


def _gaussian_kernel1d(ksize, sigma):
    half = (ksize - 1) / 2.0
    x = np.arange(ksize, dtype=np.float64) - half
    k = np.exp(-(x * x) / (2.0 * sigma * sigma))
    return (k / k.sum()).astype(np.float32)


def _filter2d_reflect101_np(img, kern):
    """cv2.filter2D (correlation) with BORDER_REFLECT_101 (numpy reference)."""
    kh, kw = kern.shape
    p = _pad_reflect101_np(img, kh // 2, kw // 2)
    h, w = img.shape
    out = np.zeros((h, w), dtype=np.float32)
    for di in range(kh):
        for dj in range(kw):
            out += kern[di, dj] * p[di:di + h, dj:dj + w]
    return out


@functools.lru_cache(maxsize=None)
def disk_np(radius, alias_blur=0.1):
    """Replicates torch_uncertainty's disk(): cv2.GaussianBlur of aliased disk."""
    if radius <= 8:
        size = np.arange(-8, 8 + 1)
        ksize = 3
    else:
        size = np.arange(-radius, radius + 1)
        ksize = 5
    xs, ys = np.meshgrid(size, size)
    aliased = np.array(xs ** 2 + ys ** 2 <= radius ** 2, dtype=np.float32)
    aliased /= np.sum(aliased)
    g1 = _gaussian_kernel1d(ksize, alias_blur)
    g2 = np.outer(g1, g1).astype(np.float32)     # separable Gaussian == outer
    return _filter2d_reflect101_np(aliased, g2)


@functools.lru_cache(maxsize=None)
def _band_matrix_device(severity, tw, twb):
    """(K*TWB, TW) bf16 band matrix with B[di*TWB + p, wl] = kern[di, p - wl].

    Tile-independent: the column reflection is handled by the halo gather, so
    the same constant matrix is shared by every W-tile and every channel.
    """
    kern = disk_np(_RADII[severity - 1], _ALIAS_BLUR[severity - 1])
    K = kern.shape[0]
    p = np.arange(twb)[:, None]                  # (TWB, 1)
    wl = np.arange(tw)[None, :]                  # (1, TW)
    dj = p - wl                                  # (TWB, TW)
    valid = (dj >= 0) & (dj < K)
    djc = np.clip(dj, 0, K - 1)
    band = np.where(valid[None, :, :], kern[:, djc], 0.0).astype(np.float32)
    return jnp.asarray(band.reshape(K * twb, tw), dtype=jnp.bfloat16)


@functools.lru_cache(maxsize=None)
def _gather_indices(h, w, r, tw, twb, n_w):
    """Reflect-101 source indices for the single halo/tiling gather."""
    row_idx = _reflect101_np(np.arange(h + 2 * r) - r, h).astype(np.int32)
    cols = np.arange(n_w)[:, None] * tw + np.arange(twb)[None, :] - r
    col_idx = _reflect101_np(cols, w).astype(np.int32)
    return jnp.asarray(row_idx), jnp.asarray(col_idx)


# ----------------------------------------------------------------------------
# Pallas kernel: im2row + one MXU matmul per (W-tile, channel), clamp [0, 1]
# ----------------------------------------------------------------------------
def _make_defocus_kernel(H, K, TWB):
    def kernel(x_ref, b_ref, o_ref, lhs_ref):
        # x_ref  : (Hp, TWB)    bf16  row+column-halo'd input tile
        # b_ref  : (K*TWB, TW)  bf16  constant band matrix (resident)
        # o_ref  : (H, TW)      f32   lane-dense output tile
        # lhs_ref: (H, K*TWB)   bf16  im2row scratch
        # im2row: lay the K row-shifted windows side by side along the lane
        # axis so the whole K x K stencil is ONE MXU contraction (no per-di
        # drain/refill cadence, no f32 accumulator round-trips through VMEM).
        for di in range(K):                       # K static copies, unrolled
            lhs_ref[:, di * TWB:(di + 1) * TWB] = x_ref[di:di + H, :]
        acc = jnp.dot(lhs_ref[...], b_ref[...],
                      preferred_element_type=jnp.float32)
        o_ref[...] = jnp.clip(acc, 0.0, 1.0)

    return kernel


def defocus_blur(img: jax.Array, severity: int) -> jax.Array:
    """Pallas implementation of DefocusBlur(severity).forward(img).

    img: float array of shape (C, H, W), values expected in [0, 1].
    """
    if not isinstance(severity, int):
        raise TypeError("Severity must be an integer.")
    if not 0 <= severity <= 5:
        raise ValueError("Severity must be between 0 and 5.")
    if severity == 0:
        return img

    kern = disk_np(_RADII[severity - 1], _ALIAS_BLUR[severity - 1])
    K = kern.shape[0]
    r = K // 2

    C, H, W = img.shape
    Hp = H + 2 * r

    # Lane-dense padded output width; multiple of 256 (when W allows) so the
    # 256-wide MXU of v6e/v7x can be filled with TW in {256, 512}.
    WL = 128 if W <= 128 else ((W + 255) // 256) * 256

    # Pick the widest tile whose double-buffered VMEM estimate fits well under
    # v7x's 64 MiB physical VMEM.
    TW = 128
    for cand in (512, 256, 128):
        if WL % cand:
            continue
        twb = cand + 2 * r
        est = (2 * Hp * twb * 2            # x tile (bf16, double-buffered)
               + 2 * K * twb * cand * 2    # band matrix (bf16, 2 copies worst case)
               + 2 * H * cand * 4          # output tile (f32, double-buffered)
               + H * K * twb * 2)          # im2row scratch (bf16)
        if est <= (40 << 20):
            TW = cand
            break
    TWB = TW + 2 * r
    n_w = WL // TW

    est = (2 * Hp * TWB * 2 + 2 * K * TWB * TW * 2
           + 2 * H * TW * 4 + H * K * TWB * 2)
    vmem_limit = int(min(max(est + (8 << 20), 16 << 20), 64 << 20))

    # One gather builds the reflect-101 row halo, the per-tile column halo and
    # the overlapping W-tiles together; bf16 operands halve HBM/VMEM traffic.
    row_idx, col_idx = _gather_indices(H, W, r, TW, TWB, n_w)
    x32 = img.astype(jnp.float32)
    x_t = x32[:, row_idx[None, :, None], col_idx[:, None, :]]       # (C, n_w, Hp, TWB)
    x_t = x_t.astype(jnp.bfloat16)

    b_flat = _band_matrix_device(severity, TW, TWB)                 # (K*TWB, TW) bf16

    out_full = pl.pallas_call(
        _make_defocus_kernel(H, K, TWB),
        out_shape=jax.ShapeDtypeStruct((C, H, WL), jnp.float32),
        grid_spec=pltpu.PrefetchScalarGridSpec(
            num_scalar_prefetch=0,
            grid=(n_w, C),
            in_specs=[
                # Row+column-halo'd tile for (channel c, W-tile j).
                pl.BlockSpec((None, None, Hp, TWB), lambda j, c: (c, j, 0, 0)),
                # Constant band matrix: index independent of the grid -> one DMA.
                pl.BlockSpec((K * TWB, TW), lambda j, c: (0, 0)),
            ],
            out_specs=pl.BlockSpec((None, H, TW), lambda j, c: (c, 0, j)),
            scratch_shapes=[pltpu.VMEM((H, K * TWB), jnp.bfloat16)],
        ),
        compiler_params=pltpu.CompilerParams(
            # W-tile axis leading & parallel (balanced dual-TC sharding on v7x),
            # the 3-long channel axis serial.
            dimension_semantics=("parallel", "arbitrary"),
            vmem_limit_bytes=vmem_limit,
        ),
    )(x_t, b_flat)

    if WL != W:
        out_full = out_full[:, :, :W]
    return out_full


# ----------------------------------------------------------------------------
# Pure numpy reference (mirrors the PyTorch forward exactly)
# ----------------------------------------------------------------------------
def defocus_blur_ref(img_np: np.ndarray, severity: int) -> np.ndarray:
    if severity == 0:
        return img_np
    kern = disk_np(_RADII[severity - 1], _ALIAS_BLUR[severity - 1])
    chans = [_filter2d_reflect101_np(img_np[c], kern)
             for c in range(img_np.shape[0])]
    return np.clip(np.stack(chans, axis=0), 0.0, 1.0)


if __name__ == "__main__":
    severity = 3  # radius=6, alias_blur=0.5 -> 17x17 disk filter
    key = jax.random.PRNGKey(0)
    img = jax.random.uniform(key, (3, 16, 16), dtype=jnp.float32)

    out = jax.block_until_ready(defocus_blur(img, severity))

    ref = defocus_blur_ref(np.asarray(img), severity)
    # bf16 MXU operands are an intentional, review-approved precision trade-off:
    # worst-case rounding of [0,1] inputs with unit-sum weights is a few 1e-3;
    # structural errors would be orders of magnitude larger.
    np.testing.assert_allclose(np.asarray(out), ref, rtol=0.0, atol=1e-2)

    print("KERNEL_OK")
</pallas_src>

<mosaic_0001>
module attributes {stable_mosaic.version = 11 : i64} {
  func.func @kernel(%arg0: i32, %arg1: i32, %arg2: memref<1x1x32x144xbf16, #tpu.memory_space<vmem>>, %arg3: memref<2448x128xbf16, #tpu.memory_space<vmem>>, %arg4: memref<1x16x128xf32, #tpu.memory_space<vmem>>, %arg5: memref<16x2448xbf16, #tpu.memory_space<vmem>>) attributes {dimension_semantics = [#tpu.dimension_semantics<parallel>, #tpu.dimension_semantics<arbitrary>], iteration_bounds = array<i64: 1, 3>, scalar_prefetch = 0 : i64, scratch_operands = 1 : i64, tpu.core_type = #tpu.core_type<tc>, window_params = [{transform_indices = @transform_0, window_bounds = array<i64: 1, 1, 32, 144>}, {pipeline_mode = #tpu.pipeline_mode<synchronous>, transform_indices = @transform_1, window_bounds = array<i64: 2448, 128>}, {transform_indices = @transform_2, window_bounds = array<i64: 1, 16, 128>}]} {
    %c0 = arith.constant 0 : index
    %c0_0 = arith.constant 0 : index
    %c0_1 = arith.constant 0 : index
    %c0_2 = arith.constant 0 : index
    %0 = vector.load %arg2[%c0, %c0_0, %c0_1, %c0_2] : memref<1x1x32x144xbf16, #tpu.memory_space<vmem>>, vector<1x1x16x144xbf16>
    %1 = vector.shape_cast %0 : vector<1x1x16x144xbf16> to vector<16x144xbf16>
    %c0_3 = arith.constant 0 : index
    %c0_4 = arith.constant 0 : index
    %2 = vector.load %arg5[%c0_3, %c0_4] : memref<16x2448xbf16, #tpu.memory_space<vmem>>, vector<16x144xbf16>
    tpu.vector_store %arg5[%c0_3, %c0_4], %1 {strides = array<i32>} : memref<16x2448xbf16, #tpu.memory_space<vmem>>, vector<16x144xbf16>,
    %c0_5 = arith.constant 0 : index
    %c0_6 = arith.constant 0 : index
    %c1 = arith.constant 1 : index
    %c0_7 = arith.constant 0 : index
    %3 = vector.load %arg2[%c0_5, %c0_6, %c1, %c0_7] : memref<1x1x32x144xbf16, #tpu.memory_space<vmem>>, vector<1x1x16x144xbf16>
    %4 = vector.shape_cast %3 : vector<1x1x16x144xbf16> to vector<16x144xbf16>
    %c0_8 = arith.constant 0 : index
    %c144 = arith.constant 144 : index
    %5 = vector.load %arg5[%c0_8, %c144] : memref<16x2448xbf16, #tpu.memory_space<vmem>>, vector<16x144xbf16>
    tpu.vector_store %arg5[%c0_8, %c144], %4 {strides = array<i32>} : memref<16x2448xbf16, #tpu.memory_space<vmem>>, vector<16x144xbf16>,
    %c0_9 = arith.constant 0 : index
    %c0_10 = arith.constant 0 : index
    %c2 = arith.constant 2 : index
    %c0_11 = arith.constant 0 : index
    %6 = vector.load %arg2[%c0_9, %c0_10, %c2, %c0_11] : memref<1x1x32x144xbf16, #tpu.memory_space<vmem>>, vector<1x1x16x144xbf16>
    %7 = vector.shape_cast %6 : vector<1x1x16x144xbf16> to vector<16x144xbf16>
    %c0_12 = arith.constant 0 : index
    %c288 = arith.constant 288 : index
    %8 = vector.load %arg5[%c0_12, %c288] : memref<16x2448xbf16, #tpu.memory_space<vmem>>, vector<16x144xbf16>
    tpu.vector_store %arg5[%c0_12, %c288], %7 {strides = array<i32>} : memref<16x2448xbf16, #tpu.memory_space<vmem>>, vector<16x144xbf16>,
    %c0_13 = arith.constant 0 : index
    %c0_14 = arith.constant 0 : index
    %c3 = arith.constant 3 : index
    %c0_15 = arith.constant 0 : index
    %9 = vector.load %arg2[%c0_13, %c0_14, %c3, %c0_15] : memref<1x1x32x144xbf16, #tpu.memory_space<vmem>>, vector<1x1x16x144xbf16>
    %10 = vector.shape_cast %9 : vector<1x1x16x144xbf16> to vector<16x144xbf16>
    %c0_16 = arith.constant 0 : index
    %c432 = arith.constant 432 : index
    %11 = vector.load %arg5[%c0_16, %c432] : memref<16x2448xbf16, #tpu.memory_space<vmem>>, vector<16x144xbf16>
    tpu.vector_store %arg5[%c0_16, %c432], %10 {strides = array<i32>} : memref<16x2448xbf16, #tpu.memory_space<vmem>>, vector<16x144xbf16>,
    %c0_17 = arith.constant 0 : index
    %c0_18 = arith.constant 0 : index
    %c4 = arith.constant 4 : index
    %c0_19 = arith.constant 0 : index
    %12 = vector.load %arg2[%c0_17, %c0_18, %c4, %c0_19] : memref<1x1x32x144xbf16, #tpu.memory_space<vmem>>, vector<1x1x16x144xbf16>
    %13 = vector.shape_cast %12 : vector<1x1x16x144xbf16> to vector<16x144xbf16>
    %c0_20 = arith.constant 0 : index
    %c576 = arith.constant 576 : index
    %14 = vector.load %arg5[%c0_20, %c576] : memref<16x2448xbf16, #tpu.memory_space<vmem>>, vector<16x144xbf16>
    tpu.vector_store %arg5[%c0_20, %c576], %13 {strides = array<i32>} : memref<16x2448xbf16, #tpu.memory_space<vmem>>, vector<16x144xbf16>,
    %c0_21 = arith.constant 0 : index
    %c0_22 = arith.constant 0 : index
    %c5 = arith.constant 5 : index
    %c0_23 = arith.constant 0 : index
    %15 = vector.load %arg2[%c0_21, %c0_22, %c5, %c0_23] : memref<1x1x32x144xbf16, #tpu.memory_space<vmem>>, vector<1x1x16x144xbf16>
    %16 = vector.shape_cast %15 : vector<1x1x16x144xbf16> to vector<16x144xbf16>
    %c0_24 = arith.constant 0 : index
    %c720 = arith.constant 720 : index
    %17 = vector.load %arg5[%c0_24, %c720] : memref<16x2448xbf16, #tpu.memory_space<vmem>>, vector<16x144xbf16>
    tpu.vector_store %arg5[%c0_24, %c720], %16 {strides = array<i32>} : memref<16x2448xbf16, #tpu.memory_space<vmem>>, vector<16x144xbf16>,
    %c0_25 = arith.constant 0 : index
    %c0_26 = arith.constant 0 : index
    %c6 = arith.constant 6 : index
    %c0_27 = arith.constant 0 : index
    %18 = vector.load %arg2[%c0_25, %c0_26, %c6, %c0_27] : memref<1x1x32x144xbf16, #tpu.memory_space<vmem>>, vector<1x1x16x144xbf16>
    %19 = vector.shape_cast %18 : vector<1x1x16x144xbf16> to vector<16x144xbf16>
    %c0_28 = arith.constant 0 : index
    %c864 = arith.constant 864 : index
    %20 = vector.load %arg5[%c0_28, %c864] : memref<16x2448xbf16, #tpu.memory_space<vmem>>, vector<16x144xbf16>
    tpu.vector_store %arg5[%c0_28, %c864], %19 {strides = array<i32>} : memref<16x2448xbf16, #tpu.memory_space<vmem>>, vector<16x144xbf16>,
    %c0_29 = arith.constant 0 : index
    %c0_30 = arith.constant 0 : index
    %c7 = arith.constant 7 : index
    %c0_31 = arith.constant 0 : index
    %21 = vector.load %arg2[%c0_29, %c0_30, %c7, %c0_31] : memref<1x1x32x144xbf16, #tpu.memory_space<vmem>>, vector<1x1x16x144xbf16>
    %22 = vector.shape_cast %21 : vector<1x1x16x144xbf16> to vector<16x144xbf16>
    %c0_32 = arith.constant 0 : index
    %c1008 = arith.constant 1008 : index
    %23 = vector.load %arg5[%c0_32, %c1008] : memref<16x2448xbf16, #tpu.memory_space<vmem>>, vector<16x144xbf16>
    tpu.vector_store %arg5[%c0_32, %c1008], %22 {strides = array<i32>} : memref<16x2448xbf16, #tpu.memory_space<vmem>>, vector<16x144xbf16>,
    %c0_33 = arith.constant 0 : index
    %c0_34 = arith.constant 0 : index
    %c8 = arith.constant 8 : index
    %c0_35 = arith.constant 0 : index
    %24 = vector.load %arg2[%c0_33, %c0_34, %c8, %c0_35] : memref<1x1x32x144xbf16, #tpu.memory_space<vmem>>, vector<1x1x16x144xbf16>
    %25 = vector.shape_cast %24 : vector<1x1x16x144xbf16> to vector<16x144xbf16>
    %c0_36 = arith.constant 0 : index
    %c1152 = arith.constant 1152 : index
    %26 = vector.load %arg5[%c0_36, %c1152] : memref<16x2448xbf16, #tpu.memory_space<vmem>>, vector<16x144xbf16>
    tpu.vector_store %arg5[%c0_36, %c1152], %25 {strides = array<i32>} : memref<16x2448xbf16, #tpu.memory_space<vmem>>, vector<16x144xbf16>,
    %c0_37 = arith.constant 0 : index
    %c0_38 = arith.constant 0 : index
    %c9 = arith.constant 9 : index
    %c0_39 = arith.constant 0 : index
    %27 = vector.load %arg2[%c0_37, %c0_38, %c9, %c0_39] : memref<1x1x32x144xbf16, #tpu.memory_space<vmem>>, vector<1x1x16x144xbf16>
    %28 = vector.shape_cast %27 : vector<1x1x16x144xbf16> to vector<16x144xbf16>
    %c0_40 = arith.constant 0 : index
    %c1296 = arith.constant 1296 : index
    %29 = vector.load %arg5[%c0_40, %c1296] : memref<16x2448xbf16, #tpu.memory_space<vmem>>, vector<16x144xbf16>
    tpu.vector_store %arg5[%c0_40, %c1296], %28 {strides = array<i32>} : memref<16x2448xbf16, #tpu.memory_space<vmem>>, vector<16x144xbf16>,
    %c0_41 = arith.constant 0 : index
    %c0_42 = arith.constant 0 : index
    %c10 = arith.constant 10 : index
    %c0_43 = arith.constant 0 : index
    %30 = vector.load %arg2[%c0_41, %c0_42, %c10, %c0_43] : memref<1x1x32x144xbf16, #tpu.memory_space<vmem>>, vector<1x1x16x144xbf16>
    %31 = vector.shape_cast %30 : vector<1x1x16x144xbf16> to vector<16x144xbf16>
    %c0_44 = arith.constant 0 : index
    %c1440 = arith.constant 1440 : index
    %32 = vector.load %arg5[%c0_44, %c1440] : memref<16x2448xbf16, #tpu.memory_space<vmem>>, vector<16x144xbf16>
    tpu.vector_store %arg5[%c0_44, %c1440], %31 {strides = array<i32>} : memref<16x2448xbf16, #tpu.memory_space<vmem>>, vector<16x144xbf16>,
    %c0_45 = arith.constant 0 : index
    %c0_46 = arith.constant 0 : index
    %c11 = arith.constant 11 : index
    %c0_47 = arith.constant 0 : index
    %33 = vector.load %arg2[%c0_45, %c0_46, %c11, %c0_47] : memref<1x1x32x144xbf16, #tpu.memory_space<vmem>>, vector<1x1x16x144xbf16>
    %34 = vector.shape_cast %33 : vector<1x1x16x144xbf16> to vector<16x144xbf16>
    %c0_48 = arith.constant 0 : index
    %c1584 = arith.constant 1584 : index
    %35 = vector.load %arg5[%c0_48, %c1584] : memref<16x2448xbf16, #tpu.memory_space<vmem>>, vector<16x144xbf16>
    tpu.vector_store %arg5[%c0_48, %c1584], %34 {strides = array<i32>} : memref<16x2448xbf16, #tpu.memory_space<vmem>>, vector<16x144xbf16>,
    %c0_49 = arith.constant 0 : index
    %c0_50 = arith.constant 0 : index
    %c12 = arith.constant 12 : index
    %c0_51 = arith.constant 0 : index
    %36 = vector.load %arg2[%c0_49, %c0_50, %c12, %c0_51] : memref<1x1x32x144xbf16, #tpu.memory_space<vmem>>, vector<1x1x16x144xbf16>
    %37 = vector.shape_cast %36 : vector<1x1x16x144xbf16> to vector<16x144xbf16>
    %c0_52 = arith.constant 0 : index
    %c1728 = arith.constant 1728 : index
    %38 = vector.load %arg5[%c0_52, %c1728] : memref<16x2448xbf16, #tpu.memory_space<vmem>>, vector<16x144xbf16>
    tpu.vector_store %arg5[%c0_52, %c1728], %37 {strides = array<i32>} : memref<16x2448xbf16, #tpu.memory_space<vmem>>, vector<16x144xbf16>,
    %c0_53 = arith.constant 0 : index
    %c0_54 = arith.constant 0 : index
    %c13 = arith.constant 13 : index
    %c0_55 = arith.constant 0 : index
    %39 = vector.load %arg2[%c0_53, %c0_54, %c13, %c0_55] : memref<1x1x32x144xbf16, #tpu.memory_space<vmem>>, vector<1x1x16x144xbf16>
    %40 = vector.shape_cast %39 : vector<1x1x16x144xbf16> to vector<16x144xbf16>
    %c0_56 = arith.constant 0 : index
    %c1872 = arith.constant 1872 : index
    %41 = vector.load %arg5[%c0_56, %c1872] : memref<16x2448xbf16, #tpu.memory_space<vmem>>, vector<16x144xbf16>
    tpu.vector_store %arg5[%c0_56, %c1872], %40 {strides = array<i32>} : memref<16x2448xbf16, #tpu.memory_space<vmem>>, vector<16x144xbf16>,
    %c0_57 = arith.constant 0 : index
    %c0_58 = arith.constant 0 : index
    %c14 = arith.constant 14 : index
    %c0_59 = arith.constant 0 : index
    %42 = vector.load %arg2[%c0_57, %c0_58, %c14, %c0_59] : memref<1x1x32x144xbf16, #tpu.memory_space<vmem>>, vector<1x1x16x144xbf16>
    %43 = vector.shape_cast %42 : vector<1x1x16x144xbf16> to vector<16x144xbf16>
    %c0_60 = arith.constant 0 : index
    %c2016 = arith.constant 2016 : index
    %44 = vector.load %arg5[%c0_60, %c2016] : memref<16x2448xbf16, #tpu.memory_space<vmem>>, vector<16x144xbf16>
    tpu.vector_store %arg5[%c0_60, %c2016], %43 {strides = array<i32>} : memref<16x2448xbf16, #tpu.memory_space<vmem>>, vector<16x144xbf16>,
    %c0_61 = arith.constant 0 : index
    %c0_62 = arith.constant 0 : index
    %c15 = arith.constant 15 : index
    %c0_63 = arith.constant 0 : index
    %45 = vector.load %arg2[%c0_61, %c0_62, %c15, %c0_63] : memref<1x1x32x144xbf16, #tpu.memory_space<vmem>>, vector<1x1x16x144xbf16>
    %46 = vector.shape_cast %45 : vector<1x1x16x144xbf16> to vector<16x144xbf16>
    %c0_64 = arith.constant 0 : index
    %c2160 = arith.constant 2160 : index
    %47 = vector.load %arg5[%c0_64, %c2160] : memref<16x2448xbf16, #tpu.memory_space<vmem>>, vector<16x144xbf16>
    tpu.vector_store %arg5[%c0_64, %c2160], %46 {strides = array<i32>} : memref<16x2448xbf16, #tpu.memory_space<vmem>>, vector<16x144xbf16>,
    %c0_65 = arith.constant 0 : index
    %c0_66 = arith.constant 0 : index
    %c16 = arith.constant 16 : index
    %c0_67 = arith.constant 0 : index
    %48 = vector.load %arg2[%c0_65, %c0_66, %c16, %c0_67] : memref<1x1x32x144xbf16, #tpu.memory_space<vmem>>, vector<1x1x16x144xbf16>
    %49 = vector.shape_cast %48 : vector<1x1x16x144xbf16> to vector<16x144xbf16>
    %c0_68 = arith.constant 0 : index
    %c2304 = arith.constant 2304 : index
    %50 = vector.load %arg5[%c0_68, %c2304] : memref<16x2448xbf16, #tpu.memory_space<vmem>>, vector<16x144xbf16>
    tpu.vector_store %arg5[%c0_68, %c2304], %49 {strides = array<i32>} : memref<16x2448xbf16, #tpu.memory_space<vmem>>, vector<16x144xbf16>,
    %c0_69 = arith.constant 0 : index
    %c0_70 = arith.constant 0 : index
    %51 = vector.load %arg5[%c0_69, %c0_70] : memref<16x2448xbf16, #tpu.memory_space<vmem>>, vector<16x2448xbf16>
    %c0_71 = arith.constant 0 : index
    %c0_72 = arith.constant 0 : index
    %52 = vector.load %arg3[%c0_71, %c0_72] : memref<2448x128xbf16, #tpu.memory_space<vmem>>, vector<2448x128xbf16>
    %cst = arith.constant dense<0.000000e+00> : vector<16x128xf32>
    %53 = tpu.matmul %51, %52, %cst {dimension_numbers = #tpu.dot_dimension_numbers<[1], [0], [0], [1], [0, 0, 1, 1], [], []>} : vector<16x2448xbf16>, vector<2448x128xbf16>, vector<16x128xf32> -> vector<16x128xf32>
    %cst_73 = arith.constant 0.000000e+00 : f32
    %cst_74 = arith.constant 1.000000e+00 : f32
    %54 = vector.broadcast %cst_73 : f32 to vector<16x128xf32>
    %55 = arith.maximumf %54, %53 : vector<16x128xf32>
    %56 = vector.broadcast %cst_74 : f32 to vector<16x128xf32>
    %57 = arith.minimumf %56, %55 : vector<16x128xf32>
    %c0_75 = arith.constant 0 : index
    %c0_76 = arith.constant 0 : index
    %c0_77 = arith.constant 0 : index
    %58 = vector.load %arg4[%c0_75, %c0_76, %c0_77] : memref<1x16x128xf32, #tpu.memory_space<vmem>>, vector<1x16x128xf32>
    %59 = vector.shape_cast %58 : vector<1x16x128xf32> to vector<16x128xf32>
    %60 = vector.shape_cast %57 : vector<16x128xf32> to vector<1x16x128xf32>
    tpu.vector_store %arg4[%c0_75, %c0_76, %c0_77], %60 {strides = array<i32>} : memref<1x16x128xf32, #tpu.memory_space<vmem>>, vector<1x16x128xf32>,
    return
  }
  func.func @transform_0(%arg0: i32, %arg1: i32) -> (i32, i32, i32, i32) {
    %c0_i32 = arith.constant 0 : i32
    %c0_i32_0 = arith.constant 0 : i32
    %c0_i32_1 = arith.constant 0 : i32
    return %arg1, %arg0, %c0_i32, %c0_i32_0 : i32, i32, i32, i32
  }
  func.func @transform_1(%arg0: i32, %arg1: i32) -> (i32, i32) {
    %c0_i32 = arith.constant 0 : i32
    %c0_i32_0 = arith.constant 0 : i32
    %c0_i32_1 = arith.constant 0 : i32
    return %c0_i32, %c0_i32_0 : i32, i32
  }
  func.func @transform_2(%arg0: i32, %arg1: i32) -> (i32, i32, i32) {
    %c0_i32 = arith.constant 0 : i32
    %c0_i32_0 = arith.constant 0 : i32
    return %arg1, %c0_i32, %arg0 : i32, i32, i32
  }
}

</mosaic_0001>

<bundles_post_ra>
// kernel: tpu_custom_call.1
= control target key start
LH: loop header
LB: loop body
LE: loop exit
PB: predicated region body
PF: predicated region fallthrough
CT: control target
= control target key end

     0   :  { %7 = vsyncpa [#allocation4], 0  ;;  %s4022_s0 = inlined_call_operand.hbm [shape: bf16[3,1,32,144], index: 0, kind: input, shape index: {}]   ;;  %s4023_s1 = inlined_call_operand.hbm [shape: bf16[2448,128], index: 1, kind: input, shape index: {}]   ;;  %s4024_s2 = inlined_call_operand.hbm [shape: f32[3,16,128], index: 2, kind: output, shape index: {}]  }
   0x1   :  { %9 = vsyncpa [#allocation4 + $0x1], 0 }
   0x2   :  { %10 = vsyncpa [#allocation7], 0 }
   0x3   :  { %11 = vsyncpa [#allocation5], 0 }
   0x4   :  { %13 = vsyncpa [#allocation5 + $0x1], 0  ;;  %s3449_s9 = smov 0   ;;  %s3451_s10 = smov 0  }
   0x5   :  { %s3453_s11 = smov 0   ;;  %s3455_s12 = smov 0  }
   0x6   :  { %s3457_s13 = smov 0   ;;  %s3459_s14 = smov 0  }
   0x7 LB: > { %s2608_s15 = sadd.s32 4294967295, %s3415_s14   ;;  %s2609_s16 = sadd.s32 4294967294, %s3415_s14   ;;  %s3415_s14 = sphi %s3459_s14, %s19_s14   ;;  %s3411_s13 = sphi %s3457_s13, %s4071_s13   ;;  %s3407_s12 = sphi %s3455_s12, %s4070_s12   ;;  %s3403_s11 = sphi %s3453_s11, %s4069_s11   ;;  %s3399_s10 = sphi %s3451_s10, %s4068_s10   ;;  %s3395_s9 = sphi %s3449_s9, %s4067_s9  }
   0x8   : > { %p53_p0 = scmp.ne.s32.totalorder %s3399_s10, %s3395_s9  ;;  %p3483_p1 = scmp.eq.s32.totalorder %s2608_s15, 0 }
   0x9   : > { %p3487_p2 = scmp.eq.s32.totalorder %s2608_s15, 2  ;;  %p106_p3 = scmp.eq.s32.totalorder %s2609_s16, 2 }
   0xa   : > { %p3493_p4 = por %p3483_p1, %p53_p0  ;;  %p2610_p5 = scmp.ge.s32.totalorder %s3415_s14, 1 }
   0xb   : > { %p3498_p6 = por %p106_p3, %p53_p0  ;;  %p113_p7 = scmp.lt.s32.totalorder %s3415_s14, 4 }
   0xc   : > { %s3417_s22 = smov [#allocation6]   ;;  %s28_s25 = sadd.s32 1, %s3411_s13 }
   0xd   : > { %s4029_s20 = scalar_select %p3498_p6, 1, 0 }
   0xe   : > { %p3503_p8 = pnand %p2610_p5, %p113_p7  ;;  %s125_s23 = sshll.u32 %s3417_s22, 4  ;;  %s126_s23 = int_to_ptr.vmem [resolvable:$true] %s125_s23 }
   0xf   : > { %s3288_s26 = scalar_lea.vmem %s126_s23, 19584  ;;  %p3296_p3 = scmp.lt.s32.totalorder %s126_s23, %s126_s23 }
  0x10   : > { %p3015_p9 = pneg %p3503_p8  ;;  %p3289_p12 = scmp.ne.s32.totalorder %s126_s23, %s3288_s26 }
  0x11   : > { %p3297_p5 = scmp.lt.s32.totalorder %s3288_s26, %s3288_s26 }
  0x12   : > { %p3511_p10 = pnand %p3015_p9, %p3483_p1 }
  0x13   : > { %p3298_p7 = por %p3297_p5, %p3296_p3 }
  0x14   : > { %p3279_p11 = pneg %p3511_p10 }
  0x16   : > { %p3291_p13 = pnand %p3289_p12, %p3279_p11 }
  0x18   : > { %p3292_p0 = pneg %p3291_p13 }
  0x1a   : > { %p3299_p6 = pnand %p3298_p7, %p3292_p0 }
  0x1c   : > { %3302 = shalt.err (!%p3299_p6)
}
  0x1d   : > { %s3418_s27 = smov 64   ;;  %s3419_s28 = smov 4  }
  0x1e   : > { %3018 = dma.hbm_to_vmem [thread:$0]  (!%p3511_p10), %s4023_s1, 19584, %s126_s23, [#allocation7], %s3418_s27, %s3418_s27, %s3419_s28  }
  0x1f   : > { %p29_p9 = scmp.ge.s32.totalorder %s28_s25, 3  ;;  %s40_s3 = sadd.s32 1, %s3403_s11 }
  0x20   : > { %p47_p6 = scmp.ne.s32.totalorder %s3403_s11, %s3399_s10  ;;  %p48_p11 = scmp.eq.s32.totalorder %s3415_s14, 0 }
  0x21   : > { %s4073_s25 = smov (%p29_p9, %s28_s25), 0  ;;  %p3028_p0 = scmp.lt.s32.totalorder %s3415_s14, 3 }
  0x22   : > { %p3529_p12 = por %p48_p11, %p47_p6  ;;  %p3535_p13 = por %p3487_p2, %p47_p6 }
  0x23   : > { %s35_s6 = ssub.s32 %s3411_s13, %s4073_s25  ;;  %s139_s7 = sand.u32 1, %s3403_s11  }
  0x24   : > { %s4033_s5 = scalar_select %p3535_p13, 1, 0 }
  0x25   : > { %p38_p10 = scmp.eq.s32.totalorder %s35_s6, 0  ;;  %s2613_s8 = sshll.u32 %s139_s7, 5 }
  0x26   : > { %s2807_s16 = sshll.u32 %s3411_s13, 9  ;;  %s143_s26 = scalar_lea.vmem [#allocation3], %s2613_s8 }
  0x27   : > { %s3544_s15 = scalar_select %p38_p10, %s3403_s11, %s40_s3  }
  0x28   : > { %s151_s24 = scalar_lea.hbm %s4022_s0, %s2807_s16  ;;  %s152_s27 = sshll.u32 %s143_s26, 4  ;;  %s153_s27 = int_to_ptr.vmem [resolvable:$true] %s152_s27 }
  0x29   : > { %p3552_p2 = pnand %p3028_p0, %p3529_p12  ;;  %s140_s28 = scalar_lea.sflag [#allocation4], %s139_s7 }
  0x2a   : > { %s3316_s29 = scalar_lea.vmem %s153_s27, 512  ;;  %s3420_s30 = smov [#allocation3]  }
  0x2b   : > { %p3305_p3 = pneg %p3552_p2  ;;  %p3317_p5 = scmp.ne.s32.totalorder %s153_s27, %s3316_s29 }
  0x2c   : > { %s3321_s3 = sshll.u32 %s3420_s30, 4  ;;  %s3322_s3 = int_to_ptr.vmem [resolvable:$false] %s3321_s3 }
  0x2d   : > { %p3319_p7 = pnand %p3317_p5, %p3305_p3  ;;  %s3323_s6 = scalar_lea.vmem %s3322_s3, 1024 }
  0x2e   : > { %p3324_p6 = scmp.lt.s32.totalorder %s153_s27, %s3322_s3  ;;  %p3325_p11 = scmp.lt.s32.totalorder %s3323_s6, %s3316_s29 }
  0x2f   : > { %p3320_p9 = pneg %p3319_p7 }
  0x30   : > { %p3326_p10 = por %p3325_p11, %p3324_p6 }
  0x32   : > { %p3327_p13 = pnand %p3326_p10, %p3320_p9 }
  0x34   : > { %3330 = shalt.err (!%p3327_p13)
}
  0x35   : > { %s3421_s4 = smov 128   ;;  %s3422_s8 = smov 8  }
  0x36   : > { %3022 = dma.hbm_to_vmem [thread:$0]  (!%p3552_p2), %s151_s24, 512, %s153_s27, %s140_s28, %s3421_s4, %s3421_s4, %s3422_s8  }
  0x37   : > { %164 = sbr.rel (%p3503_p8) target bundleno = 561 (0x231), region = 28  ;;  %s3563_s7 = sand.u32 (!%p3503_p8), 1, %s3399_s10  }
  0x38   : > { %s2617_s16 = sshll.u32 (!%p3503_p8), %s3563_s7, 5  ;;  %s167_s22 = scalar_lea.sflag (!%p3503_p8), [#allocation4], %s3563_s7 }
  0x39   : > { %s3567_s23 = scalar_lea.vmem (!%p3503_p8), [#allocation3], %s2617_s16 }
  0x3c   : > { %3382 = dma.done.wait (%p3493_p4), %s167_s22, 512  }
  0x3d   : > { %3384 = vsyncadd (%p3493_p4), %s167_s22, 4294966784 }
  0x3e   : > { %3386 = dma.done.wait (%p3483_p1), [#allocation7], 19584  }
  0x3f   : > { %3388 = vsyncadd (%p3483_p1), [#allocation7], 4294947712  ;;  %vm255_vm0 = vcmask 1042432   ;;  %vm256_vm1 = vcmask 1046532   ;;  %vm206_vm2 = vsmask.f32 3328 }
  0x40   : > { %vm207_vm3 = vsmask.f32 7440  ;;  %vm3577_vm4 = vmor %vm255_vm0, %vm256_vm1  ;;  %vm284_vm5 = vsmask.f32 2304  ;;  %vm285_vm6 = vsmask.f32 6416 }
  0x41   : > { %vm198_vm7 = vcmask 1043456   ;;  %vm199_vm8 = vcmask 130052   ;;  %v249_v1 = vld [vmem:[%s3567_s23] sm:$0xee]  ;;  %v3583_v2 = vld [vmem:[%s3567_s23 + $0x8] sm:$0xff]  ;;  %vm337_vm9 = vcmask 1041408   ;;  %vm3632_vm14 = vmor %vm206_vm2, %vm207_vm3 }
  0x42   : > { %v203_v3 = vld [vmem:[%s3567_s23] sm:$0xff]  ;;  %vm338_vm10 = vcmask 1045508   ;;  %v2620_v4 = vrot.slane %v249_v1, 9  ;;  %v260_v5 = vrot.slane %v3583_v2, 5  ;;  %v251_v8 = vld [vmem:[%s3567_s23 + $0x10] sm:$0x11]  ;;  %vm3598_vm11 = vmor %vm199_vm8, %vm198_vm7 }
  0x43   : > { %v210_v6 = vshrl.u32 %v203_v3, 16  ;;  %v213_v7 = vshll.u32 %v203_v3, 16  ;;  %v3589_v9 = vshll.u32 %v3583_v2, 16  ;;  %v3592_v10 = vshrl.u32 %v3583_v2, 16  ;;  %v205_v12 = vld [vmem:[%s3567_s23 + $0x10] sm:$0x11]  ;;  %vm3648_vm0 = vmor %vm284_vm5, %vm285_vm6 }
  0x44   : > { %v263_v11 = vrot.slane %v251_v8, 5  ;;  %v342_v13 = vrot.slane %v3583_v2, 6  ;;  %v261_v15 = vsel %vm3577_vm4, %v2620_v4, %v260_v5  ;;  %v262_v18 = vrot.slane %v260_v5, 4  ;;  %v283_v19 = vld [vmem:[%s3567_s23 + $0x10] sm:$0x33]  ;;  %491 = vst.msk [vmem:[#allocation2 + $0x24] sm:$0xff] %vm3598_vm11, %v3583_v2  ;;  %vm3664_vm2 = vmor %vm337_vm9, %vm338_vm10 }
  0x45   : > { %v212_v16 = vrot.slane %v210_v6, 4  ;;  %v215_v17 = vrot.slane %v213_v7, 5  ;;  %v3606_v20 = vld [vmem:[%s3567_s23 + $0x10] sm:$0xff]  ;;  %201 = vst.msk [vmem:[#allocation2] sm:$0xff] %vm3598_vm11, %v203_v3  ;;  %202 = vst.msk [vmem:[#allocation2 + $0x50] sm:$0xff] %vm3598_vm11, %v3583_v2  ;;  %s3423_s17 = smov 32  }
  0x46   : > { %265 = vrot.lane.b32.xlu1 %v261_v15, %s3423_s17  ;;  %v221_v21 = vrot.slane %v3589_v9, 5  ;;  %v225_v22 = vrot.slane %v3592_v10, 4  ;;  %v229_v23 = vshll.u32 %v205_v12, 16  ;;  %v299_v24 = vrot.slane %v3592_v10, 5  ;;  %v281_v25 = vld [vmem:[%s3567_s23] sm:$0xee] }
  0x47   : > { %vm366_vm12 = vsmask.f32 1280  ;;  %vm367_vm13 = vsmask.f32 5392  ;;  %492 = vst.msk [vmem:[#allocation2 + $0x74] sm:$0xff] %vm3598_vm11, %v3606_v20  ;;  %732 = vst.msk [vmem:[#allocation2 + $0x48] sm:$0xff] %vm3598_vm11, %v3606_v20  ;;  %v216_v26 = vor.u32 %v215_v17, %v212_v16  ;;  %v264_v27 = vsel %vm3577_vm4, %v262_v18, %v263_v11 }
  0x48   : > { %v302_v28 = vrot.slane %v3589_v9, 6  ;;  %v307_v29 = vshrl.u32 %v283_v19, 16  ;;  %v3636_v31 = vor.u32 %v225_v22, %v221_v21  ;;  %v231_v32 = vrot.slane %v229_v23, 5  ;;  %v3094_v35 = vld [vmem:[#allocation6 + $0x78] sm:$0xff]   ;;  %v333_v40 = vld [vmem:[%s3567_s23 + $0x10] sm:$0x33]  ;;  %vm3685_vm5 = vmor %vm366_vm12, %vm367_vm13 }
  0x49   : > { %v310_v33 = vshll.u32 %v283_v19, 16  ;;  %v288_v34 = vshrl.u32 %v281_v25, 16  ;;  %v217_v36 = vrot.slane %v216_v26, 4  ;;  %v291_v39 = vshll.u32 %v281_v25, 16  ;;  %v3095_v41 = vld [vmem:[#allocation6 + $0x38] sm:$0xff]   ;;  %2809 = vmatprep.subr.bf16.mxu0 %v3094_v35  ;;  %v3096_v51 = vld [vmem:[#allocation6 + $0x70] sm:$0xff]  }
  0x4a   : > { %v3638_v37 = vor.u32 %v302_v28, %v299_v24  ;;  %v309_v38 = vrot.slane %v307_v29, 5  ;;  %267 = vrot.lane.b32.xlu1 %v264_v27, %s3423_s17  ;;  %v227_v42 = vrot.slane %v3636_v31, 4  ;;  %v365_v45 = vld [vmem:[%s3567_s23 + $0x10] sm:$0x77]  ;;  %vm419_vm15 = vcmask 1040384   ;;  %2810 = vmatpush3.bf16.msra.mxu0 %v3095_v41  ;;  %s3424_s19 = smov 16  }
  0x4b   : > { %v312_v43 = vrot.slane %v310_v33, 6  ;;  %v290_v44 = vrot.slane %v288_v34, 5  ;;  %v222_v46 = vsel %vm3632_vm14, %v217_v36, %v221_v21  ;;  %v293_v49 = vrot.slane %v291_v39, 6  ;;  %v363_v50 = vld [vmem:[%s3567_s23] sm:$0xcc]  ;;  %2811 = vmatprep.subr.bf16.mxu0 %v3096_v51  ;;  %s3425_s21 = smov 48  }
  0x4c   : > { %v305_v48 = vrot.slane %v3638_v37, 4  ;;  %vm420_vm1 = vcmask 1044484   ;;  %233 = vrot.lane.b32.xlu0 %v222_v46, %s3424_s19  ;;  %v344_v53 = vrot.slane %v342_v13, 4  ;;  %v345_v54 = vrot.slane %v333_v40, 6  ;;  %v331_v62 = vld [vmem:[%s3567_s23] sm:$0xcc] }
  0x4d   : > { %v313_v52 = vor.u32 %v312_v43, %v309_v38  ;;  %v381_v55 = vrot.slane %v3592_v10, 6  ;;  %v232_v56 = vsel %vm3632_vm14, %v227_v42, %v231_v32  ;;  %v294_v57 = vor.u32 %v293_v49, %v290_v44  ;;  %v3097_v7 = vld [vmem:[#allocation6 + $0xf8] sm:$0xff]   ;;  %v415_v15 = vld [vmem:[%s3567_s23 + $0x10] sm:$0x77]  ;;  %v413_v25 = vld [vmem:[%s3567_s23] sm:$0x88] }
  0x4e   : > { %v384_v59 = vrot.slane %v3589_v9, 7  ;;  %v389_v60 = vshrl.u32 %v365_v45, 16  ;;  %v392_v63 = vshll.u32 %v365_v45, 16  ;;  %v370_v1 = vshrl.u32 %v363_v50, 16  ;;  %2831 = vmatprep.subr.bf16.mxu1 %v3097_v7  ;;  %v3098_v23 = vld [vmem:[#allocation6 + $0x30] sm:$0xff]   ;;  %v3099_v27 = vld [vmem:[#allocation6 + $0xb8] sm:$0xff]   ;;  %vm3713_vm7 = vmor %vm419_vm15, %vm420_vm1 }
  0x4f   : > { %v314_v61 = vsel %vm3648_vm0, %v305_v48, %v313_v52  ;;  %vm448_vm3 = vsmask.f32 256  ;;  %v295_v3 = vrot.slane %v294_v57, 4  ;;  %v373_v6 = vshll.u32 %v363_v50, 16  ;;  %s3426_s24 = smov 64   ;;  %2812 = vmatpush3.bf16.msra.mxu0 %v3098_v23  ;;  %2832 = vmatpush3.bf16.msra.mxu1 %v3099_v27  ;;  %s3427_s26 = smov 80  }
  0x50   : > { %317 = vrot.lane.b32.xlu1 %v314_v61, %s3425_s21  ;;  %v3673_v4 = vor.u32 %v384_v59, %v381_v55  ;;  %v391_v5 = vrot.slane %v389_v60, 6  ;;  %235 = vrot.lane.b32.xlu0 %v232_v56, %s3424_s19  ;;  %v346_v8 = vsel %vm3664_vm2, %v344_v53, %v345_v54  ;;  %v394_v11 = vrot.slane %v392_v63, 7  ;;  %v495_v34 = vld [vmem:[%s3567_s23 + $0x18] sm:$0x11]  ;;  %v445_v38 = vld [vmem:[%s3567_s23] sm:$0x88] }
  0x51   : > { %v372_v12 = vrot.slane %v370_v1, 6  ;;  %v424_v16 = vrot.slane %v3583_v2, 7  ;;  %v304_v17 = vsel %vm3648_vm0, %v295_v3, %v3638_v37  ;;  %v2621_v18 = vrot.slane %v331_v62, 10  ;;  %v559_v44 = vld [vmem:[%s3567_s23 + $0x18] sm:$0x33]  ;;  %v3101_v63 = vld [vmem:[#allocation6 + $0xf0] sm:$0xff]  }
  0x52   : > { %v387_v21 = vrot.slane %v3673_v4, 4  ;;  %v375_v22 = vrot.slane %v373_v6, 7  ;;  %v395_v24 = vor.u32 %v394_v11, %v391_v5  ;;  %vm449_vm6 = vsmask.f32 4368  ;;  %v557_v48 = vld [vmem:[%s3567_s23 + $0x8] sm:$0xee]  ;;  %2833 = vmatprep.subr.bf16.mxu1 %v3101_v63 }
  0x53   : > { %v3692_v26 = vshrl.u32 %v3606_v20, 16  ;;  %v426_v29 = vrot.slane %v424_v16, 4  ;;  %v427_v32 = vrot.slane %v415_v15, 7  ;;  %v3698_v33 = vshll.u32 %v3606_v20, 16  ;;  %vm3737_vm8 = vmor %vm448_vm3, %vm449_vm6  ;;  %v534_v57 = vld [vmem:[%s3567_s23 + $0x18] sm:$0x11] }
  0x54   : > { %349 = vrot.lane.b32.xlu1 %v346_v8, %s3426_s24  ;;  %v376_v28 = vor.u32 %v375_v22, %v372_v12  ;;  %315 = vrot.lane.b32.xlu0 %v304_v17, %s3425_s21  ;;  %v396_v35 = vsel %vm3685_vm5, %v387_v21, %v395_v24  ;;  %v459_v36 = vrot.slane %v3592_v10, 7  ;;  %v343_v39 = vsel %vm3664_vm2, %v2621_v18, %v342_v13  ;;  %v3100_v10 = vld [vmem:[#allocation6 + $0x68] sm:$0xff]   ;;  %s3428_s27 = smov 96   ;;  %v3103_v11 = vld [vmem:[#allocation6 + $0xb0] sm:$0xff]   ;;  %v3759_v18 = vld [vmem:[%s3567_s23 + $0x18] sm:$0x33] }
  0x55   : > { %v468_v37 = vrot.slane %v3692_v26, 7  ;;  %v508_v43 = vrot.slane %v3698_v33, 5  ;;  %v512_v45 = vrot.slane %v3692_v26, 4  ;;  %v516_v46 = vshll.u32 %v495_v34, 16  ;;  %2813 = vmatprep.subr.bf16.mxu0 %v3100_v10  ;;  %v3102_v3 = vld [vmem:[#allocation6 + $0x28] sm:$0xff]   ;;  %2834 = vmatpush3.bf16.msra.mxu1 %v3103_v11  ;;  %s3429_s18 = smov 112  }
  0x56   : > { %v377_v40 = vrot.slane %v376_v28, 4  ;;  %v2622_v13 = vrot.slane %v413_v25, 11  ;;  %v428_v49 = vsel %vm3713_vm7, %v426_v29, %v427_v32  ;;  %v464_v50 = vrot.slane %v459_v36, 4  ;;  %v3751_v6 = vld [vmem:[%s3567_s23 + $0x8] sm:$0xee]  ;;  %2814 = vmatpush3.bf16.msra.mxu0 %v3102_v3  ;;  %v3104_v25 = vld [vmem:[#allocation6 + $0x60] sm:$0xff]  }
  0x57   : > { %v3728_v51 = vor.u32 %v3698_v33, %v468_v37  ;;  %v513_v52 = vor.u32 %v512_v45, %v508_v43  ;;  %v452_v55 = vshrl.u32 %v445_v38, 16  ;;  %v518_v56 = vrot.slane %v516_v46, 5  ;;  %v627_v21 = vld [vmem:[%s3567_s23 + $0x18] sm:$0x77]  ;;  %v625_v28 = vld [vmem:[%s3567_s23 + $0x8] sm:$0xcc]  ;;  %2815 = vmatprep.subr.bf16.mxu0 %v3104_v25 }
  0x58   : > { %399 = vrot.lane.b32.xlu1 %v396_v35, %s3427_s26  ;;  %347 = vrot.lane.b32.xlu0 %v343_v39, %s3426_s24  ;;  %v386_v53 = vsel %vm3685_vm5, %v377_v40, %v3673_v4  ;;  %v540_v59 = vrot.slane %v3606_v20, 5  ;;  %v572_v60 = vrot.slane %v3692_v26, 5  ;;  %v575_v61 = vrot.slane %v3698_v33, 6  ;;  %v3105_v34 = vld [vmem:[#allocation6 + $0xe8] sm:$0xff]   ;;  %v3110_v14 = vld [vmem:[#allocation6 + $0x18] sm:$0xff]   ;;  %s2619_s28 = sshll.u32 %s3563_s7, 4 }
  0x59   : > { %v580_v62 = vshrl.u32 %v559_v44, 16  ;;  %v561_v1 = vshrl.u32 %v557_v48, 16  ;;  %v472_v4 = vsel %vm3737_vm8, %v464_v50, %v3728_v51  ;;  %v514_v5 = vrot.slane %v513_v52, 4  ;;  %2835 = vmatprep.subr.bf16.mxu1 %v3105_v34  ;;  %v3115_v25 = vld [vmem:[#allocation6 + $0x98] sm:$0xff]   ;;  %v668_v47 = vld [vmem:[%s3567_s23 + $0x8] sm:$0x88] }
  0x5a   : > { %v583_v7 = vshll.u32 %v559_v44, 16  ;;  %v564_v8 = vshll.u32 %v557_v48, 16  ;;  %v425_v12 = vsel %vm3713_vm7, %v2622_v13, %v424_v16  ;;  %v2623_v15 = vrot.slane %v452_v55, 11  ;;  %v3106_v13 = vld [vmem:[#allocation6 + $0x20] sm:$0xff]   ;;  %v3118_v34 = vld [vmem:[#allocation6 + $0x8] sm:$0xff]   ;;  %s194_s29 = scalar_lea.vmem [#allocation8], %s2619_s28 }
  0x5b   : > { %v462_v17 = vor.u32 %v459_v36, %v3589_v9  ;;  %v542_v22 = vrot.slane %v540_v59, 4  ;;  %v543_v23 = vrot.slane %v534_v57, 5  ;;  %v3764_v24 = vor.u32 %v575_v61, %v572_v60  ;;  %2816 = vmatpush3.bf16.msra.mxu0 %v3106_v13  ;;  %v3107_v61 = vld [vmem:[#allocation6 + $0xa8] sm:$0xff]   ;;  %s2512_s30 = sshll.u32 %s194_s29, 4  ;;  %s2808_s3 = sshll.u32 %s3407_s12, 8  ;;  %s3970_s30 = int_to_ptr.vmem [resolvable:$true] %s2512_s30 }
  0x5c   : > { %431 = vrot.lane.b32.xlu1 %v428_v49, %s3428_s27  ;;  %397 = vrot.lane.b32.xlu0 %v386_v53, %s3427_s26  ;;  %v582_v2 = vrot.slane %v580_v62, 5  ;;  %v563_v16 = vrot.slane %v561_v1, 5  ;;  %v566_v27 = vrot.slane %v564_v8, 6  ;;  %v608_v9 = vrot.slane %v3606_v20, 6  ;;  %v3793_v62 = vld [vmem:[%s3567_s23 + $0x18] sm:$0xff]  ;;  %v3109_v1 = vld [vmem:[#allocation6 + $0xe0] sm:$0xff]   ;;  %s3975_s8 = scalar_lea.hbm %s4024_s2, %s2808_s3 }
  0x5d   : > { %v519_v29 = vsel %vm3632_vm14, %v514_v5, %v518_v56  ;;  %v585_v32 = vrot.slane %v583_v7, 6  ;;  %v463_v35 = vsel %vm3737_vm8, %v2623_v15, %v462_v17  ;;  %v2624_v36 = vrot.slane %v3751_v6, 9  ;;  %v600_v56 = vld [vmem:[%s3567_s23 + $0x8] sm:$0xcc]  ;;  %733 = vst.msk [vmem:[#allocation2 + $0x98] sm:$0xff] %vm3598_vm11, %v3793_v62  ;;  %2836 = vmatpush3.bf16.msra.mxu1 %v3107_v61  ;;  %v3111_v6 = vld [vmem:[#allocation6 + $0xa0] sm:$0xff]  }
  0x5e   : > { %v578_v38 = vrot.slane %v3764_v24, 4  ;;  %v611_v39 = vrot.slane %v3759_v18, 6  ;;  %v648_v40 = vshrl.u32 %v627_v21, 16  ;;  %v651_v44 = vshll.u32 %v627_v21, 16  ;;  %2837 = vmatprep.subr.bf16.mxu1 %v3109_v1  ;;  %v3112_v8 = vld [vmem:[#allocation6 + $0x50] sm:$0xff]   ;;  %s2498_s16 = scalar_lea.sflag [#allocation5], %s3563_s7 }
  0x5f   : > { %v567_v10 = vor.u32 %v566_v27, %v563_v16  ;;  %v610_v45 = vrot.slane %v608_v9, 4  ;;  %v640_v46 = vrot.slane %v3692_v26, 6  ;;  %v643_v48 = vrot.slane %v3698_v33, 7  ;;  %v3108_v33 = vld [vmem:[#allocation6 + $0x58] sm:$0xff]   ;;  %s3331_s22 = scalar_lea.vmem %s3970_s30, 256  ;;  %p4065_p4 = scmp.ne.s32.totalorder %s4033_s5, 0 }
  0x60   : > { %475 = vrot.lane.b32.xlu1 %v472_v4, %s3429_s18  ;;  %429 = vrot.lane.b32.xlu0 %v425_v12, %s3428_s27  ;;  %v544_v49 = vsel %vm3577_vm4, %v542_v22, %v543_v23  ;;  %v586_v50 = vor.u32 %v585_v32, %v582_v2  ;;  %v629_v52 = vshrl.u32 %v625_v28, 16  ;;  %v632_v53 = vshll.u32 %v625_v28, 16  ;;  %v3113_v12 = vld [vmem:[#allocation6 + $0xd8] sm:$0xff]   ;;  %v3114_v22 = vld [vmem:[#allocation6 + $0x10] sm:$0xff]   ;;  %v3116_v2 = vld [vmem:[#allocation6 + $0x48] sm:$0xff]   ;;  %p3332_p1 = scmp.ne.s32.totalorder %s3970_s30, %s3331_s22  ;;  %s3431_s12 = smov [#allocation8]  }
  0x61   : > { %v509_v55 = vsel %vm3632_vm14, %v227_v42, %v508_v43  ;;  %v650_v57 = vrot.slane %v648_v40, 6  ;;  %v653_v60 = vrot.slane %v651_v44, 7  ;;  %v568_v63 = vrot.slane %v567_v10, 4  ;;  %v670_v43 = vld [vmem:[%s3567_s23 + $0x18] sm:$0x77]  ;;  %2817 = vmatprep.subr.bf16.mxu0 %v3108_v33  ;;  %2838 = vmatpush3.bf16.msra.mxu1 %v3111_v6  ;;  %v3122_v44 = vld [vmem:[#allocation6] sm:$0xff]  }
  0x62   : > { %v587_v30 = vsel %vm3648_vm0, %v578_v38, %v586_v50  ;;  %v3802_v31 = vor.u32 %v643_v48, %v640_v46  ;;  %v631_v42 = vrot.slane %v629_v52, 6  ;;  %v541_v3 = vsel %vm3577_vm4, %v2624_v36, %v540_v59  ;;  %2818 = vmatpush3.bf16.msra.mxu0 %v3110_v14  ;;  %2839 = vmatprep.subr.bf16.mxu1 %v3113_v12  ;;  %v3120_v36 = vld [vmem:[#allocation6 + $0x40] sm:$0xff]   ;;  %v3123_v10 = vld [vmem:[#allocation6 + $0x88] sm:$0xff]   ;;  %v3128_v48 = vld [vmem:[#allocation6 + $0x178] sm:$0xff]   ;;  %p3333_p8 = pnand %p3332_p1, %p4065_p4 }
  0x63   : > { %v634_v4 = vrot.slane %v632_v53, 7  ;;  %v676_v5 = vrot.slane %v3606_v20, 7  ;;  %v2625_v7 = vrot.slane %v600_v56, 10  ;;  %v612_v11 = vsel %vm3664_vm2, %v610_v45, %v611_v39  ;;  %2819 = vmatprep.subr.bf16.mxu0 %v3112_v8  ;;  %v3121_v20 = vld [vmem:[#allocation6 + $0xc8] sm:$0xff]   ;;  %v3127_v46 = vld [vmem:[#allocation6 + $0xc0] sm:$0xff]   ;;  %v3131_v50 = vld [vmem:[#allocation6 + $0x1f8] sm:$0xff]  }
  0x64   : > { %522 = vrot.lane.b32.xlu1 %v519_v29, %s3424_s19  ;;  %473 = vrot.lane.b32.xlu0 %v463_v35, %s3429_s18  ;;  %v646_v0 = vrot.slane %v3802_v31, 4  ;;  %v654_v59 = vor.u32 %v653_v60, %v650_v57  ;;  %v711_v15 = vshrl.u32 %v3793_v62, 16  ;;  %v577_v17 = vsel %vm3648_vm0, %v568_v63, %v3764_v24  ;;  %v3117_v24 = vld [vmem:[#allocation6 + $0xd0] sm:$0xff]   ;;  %v693_v45 = vld [vmem:[%s3567_s23 + $0x8] sm:$0x88]  ;;  %p3334_p12 = pneg %p3333_p8  ;;  %s3335_s23 = sshll.u32 %s3431_s12, 4  ;;  %s3336_s23 = int_to_ptr.vmem [resolvable:$false] %s3335_s23 }
  0x65   : > { %v635_v18 = vor.u32 %v634_v4, %v631_v42  ;;  %v679_v21 = vrot.slane %v670_v43, 7  ;;  %v678_v23 = vrot.slane %v676_v5, 4  ;;  %v714_v16 = vshll.u32 %v3793_v62, 16  ;;  %2840 = vmatpush3.bf16.msra.mxu1 %v3115_v25  ;;  %v3119_v35 = vld [vmem:[#allocation6 + $0x90] sm:$0xff]   ;;  %v3157_v57 = vld [vmem:[#allocation6 + $0x148] sm:$0xff]   ;;  %v3169_v43 = vld [vmem:[#allocation6 + $0x278] sm:$0xff]   ;;  %p3338_p13 = scmp.lt.s32.totalorder %s3970_s30, %s3336_s23 }
  0x66   : > { %2820 = vmatpush3.bf16.msra.mxu0 %v3114_v22  ;;  %v655_v27 = vsel %vm3685_vm5, %v646_v0, %v654_v59  ;;  %v713_v28 = vrot.slane %v711_v15, 7  ;;  %v609_v29 = vsel %vm3664_vm2, %v2625_v7, %v608_v9  ;;  %2841 = vmatprep.subr.bf16.mxu1 %v3117_v24  ;;  %v709_v58 = vrot.slane %v468_v37, 4 }
  0x67   : > { %v636_v32 = vrot.slane %v635_v18, 4  ;;  %2821 = vmatprep.subr.bf16.mxu0 %v3116_v2  ;;  %v680_v38 = vsel %vm3713_vm7, %v678_v23, %v679_v21  ;;  %v2626_v40 = vrot.slane %v668_v47, 11  ;;  %v697_v37 = vshrl.u32 %v693_v45, 16  ;;  %v3135_v21 = vld [vmem:[#allocation6 + $0x170] sm:$0xff]   ;;  %v3185_v47 = vld [vmem:[#allocation6 + $0x220] sm:$0xff]  }
  0x68   : > { %547 = vrot.lane.b32.xlu1 %v544_v49, %s3423_s17  ;;  %520 = vrot.lane.b32.xlu0 %v509_v55, %s3424_s19  ;;  %v716_v9 = vor.u32 %v714_v16, %v713_v28  ;;  %v3129_v49 = vld [vmem:[#allocation6 + $0x80] sm:$0xff]   ;;  %vm244_vm4 = vcmask 1043584   ;;  %vm245_vm9 = vcmask 261124   ;;  %vm276_vm10 = vcmask 1043712   ;;  %v3136_v28 = vld [vmem:[#allocation6 + $0x130] sm:$0xff]  }
  0x69   : > { %2842 = vmatpush3.bf16.msra.mxu1 %v3119_v35  ;;  %v645_v39 = vsel %vm3685_vm5, %v636_v32, %v3802_v31  ;;  %v677_v19 = vsel %vm3713_vm7, %v2626_v40, %v676_v5  ;;  %v2627_v13 = vrot.slane %v697_v37, 11  ;;  %vm277_vm11 = vcmask 392196   ;;  %vm3851_vm14 = vmor %vm245_vm9, %vm244_vm4  ;;  %v3124_v23 = vld [vmem:[#allocation2] ss:$80 sps:$4 sm:$0xff]   ;;  %v3176_v5 = vld [vmem:[#allocation6 + $0x2f8] sm:$0xff]  }
  0x6a   : > { %2822 = vmatpush3.bf16.msra.mxu0 %v3118_v34  ;;  %2843 = vmatprep.subr.bf16.mxu1 %v3121_v20  ;;  %v717_v26 = vsel %vm3737_vm8, %v709_v58, %v716_v9  ;;  %vm239_vm12 = vcmask 130048   ;;  %vm271_vm13 = vcmask 261120   ;;  %vm3855_vm15 = vmor %vm277_vm11, %vm276_vm10  ;;  %vm321_vm0 = vcmask 392192   ;;  %v3138_v34 = vld [vmem:[#allocation6 + $0x168] sm:$0xff]   ;;  %v3139_v35 = vld [vmem:[#allocation6 + $0x1f0] sm:$0xff]  }
  0x6b   : > { %2823 = vmatprep.subr.bf16.mxu0 %v3120_v36  ;;  %v708_v52 = vsel %vm3737_vm8, %v2627_v13, %v3728_v51  ;;  %vm326_vm1 = vcmask 1043840   ;;  %vm327_vm2 = vcmask 523268   ;;  %vm358_vm3 = vcmask 1043968   ;;  %v3143_v13 = vld [vmem:[#allocation6 + $0x1e8] sm:$0xff]   ;;  %v3193_v40 = vld [vmem:[#allocation6 + $0x210] sm:$0xff]  }
  0x6c   : > { %590 = vrot.lane.b32.xlu1 %v587_v30, %s3425_s21  ;;  %545 = vrot.lane.b32.xlu0 %v541_v3, %s3423_s17  ;;  %vm359_vm5 = vcmask 654340   ;;  %vm3866_vm6 = vmor %vm327_vm2, %vm326_vm1  ;;  %vm353_vm7 = vcmask 523264   ;;  %vm408_vm4 = vcmask 1044096   ;;  %vm409_vm9 = vcmask 785412   ;;  %v3162_v51 = vld [vmem:[#allocation6 + $0x1c8] sm:$0xff]   ;;  %s3337_s17 = scalar_lea.vmem %s3336_s23, 512 }
  0x6d   : > { %2844 = vmatpush3.bf16.msra.mxu1 %v3123_v10  ;;  %vm3875_vm8 = vmor %vm359_vm5, %vm358_vm3  ;;  %vm403_vm10 = vcmask 654336   ;;  %vm440_vm11 = vcmask 1044224   ;;  %vm441_vm2 = vcmask 916484   ;;  %vm435_vm3 = vcmask 785408   ;;  %v3140_v10 = vld [vmem:[#allocation6 + $0x128] sm:$0xff]   ;;  %p3339_p0 = scmp.lt.s32.totalorder %s3337_s17, %s3331_s22 }
  0x6e   : > { %2824 = vmatpush3.bf16.msra.mxu0 %v3122_v44  ;;  %2845 = vmatprep.subr.bf16.mxu1 %v3127_v46  ;;  %vm3889_vm1 = vmor %vm409_vm9, %vm408_vm4  ;;  %vm484_vm5 = vcmask 1044352   ;;  %vm485_vm9 = vcmask 1047556  }
  0x6f   : > { %2853 = vmatprep.subr.bf16.mxu0 %v3128_v48  ;;  %vm3900_vm4 = vmor %vm441_vm2, %vm440_vm11  ;;  %vm479_vm11 = vcmask 916480   ;;  %p3340_p2 = por %p3339_p0, %p3338_p13 }
  0x70   : > { %615 = vrot.lane.b32.xlu1 %v612_v11, %s3426_s24  ;;  %588 = vrot.lane.b32.xlu0 %v577_v17, %s3425_s21  ;;  %v3130_v17 = vld [vmem:[#allocation6 + $0x138] sm:$0xff]   ;;  %vm3912_vm2 = vmor %vm485_vm9, %vm484_vm5 }
  0x71   : > { %2846 = vmatpush3.bf16.msra.mxu1 %v3129_v49  ;;  %p3341_p3 = pnand %p3340_p2, %p3334_p12 }
  0x72   : > { %2875 = vmatprep.subr.bf16.mxu1 %v3131_v50 }
  0x74   : > { %658 = vrot.lane.b32.xlu1 %v655_v27, %s3427_s26  ;;  %613 = vrot.lane.b32.xlu0 %v609_v29, %s3426_s24  ;;  %v3137_v29 = vld [vmem:[#allocation6 + $0x1b8] sm:$0xff]  }
  0x78   : > { %683 = vrot.lane.b32.xlu1 %v680_v38, %s3428_s27  ;;  %656 = vrot.lane.b32.xlu0 %v645_v39, %s3427_s26 }
  0x7c   : > { %720 = vrot.lane.b32.xlu1 %v717_v26, %s3429_s18  ;;  %681 = vrot.lane.b32.xlu0 %v677_v19, %s3428_s27  ;;  %v3141_v26 = vld [vmem:[#allocation6 + $0x1b0] sm:$0xff]   ;;  %v3142_v19 = vld [vmem:[#allocation6 + $0x160] sm:$0xff]  }
  0x80   : > { %718 = vrot.lane.b32.xlu0 %v708_v52, %s3429_s18  ;;  %v3144_v52 = vld [vmem:[#allocation6 + $0x120] sm:$0xff]  }
  0xb8   : > { %v266_v41 = vpop.permute.xlu1 %265 }
  0xb9   : > { %v269_v55 = vrot.slane %v266_v41, 4 }
  0xbb   : > { %v272_v62 = vsel %vm271_vm13, %v269_v55, %v266_v41 }
  0xbc   : > { %v268_v53 = vpop.permute.xlu1 %267 }
  0xbd   : > { %v270_v63 = vrot.slane %v268_v53, 4 }
  0xbe   : > { %v234_v56 = vpop.permute.xlu0 %233 }
  0xbf   : > { %v237_v60 = vrot.slane %v234_v56, 4  ;;  %v273_v4 = vsel %vm271_vm13, %v270_v63, %v268_v53  ;;  %v3145_v53 = vld [vmem:[#allocation6 + $0x1a8] sm:$0xff]  }
  0xc1   : > { %v240_v54 = vsel %vm239_vm12, %v237_v60, %v234_v56  ;;  %v3146_v60 = vld [vmem:[#allocation6 + $0x158] sm:$0xff]  }
  0xc2   : > { %v318_v61 = vpop.permute.xlu1 %317  ;;  %247 = vst.msk [vmem:[#allocation2 + $0x4] sm:$0xff] %vm3851_vm14, %v240_v54  ;;  %v236_v33 = vpop.permute.xlu0 %235 }
  0xc3   : > { %v320_v30 = vrot.slane %v318_v61, 4  ;;  %v238_v31 = vrot.slane %v236_v33, 4  ;;  %279 = vst.msk [vmem:[#allocation2 + $0x8] sm:$0xff] %vm3855_vm15, %v272_v62  ;;  %v3147_v62 = vld [vmem:[#allocation6 + $0x1e0] sm:$0xff]  }
  0xc5   : > { %v241_v42 = vsel %vm239_vm12, %v238_v31, %v236_v33  ;;  %v323_v1 = vsel %vm321_vm0, %v320_v30, %v318_v61  ;;  %v3148_v30 = vld [vmem:[#allocation6 + $0x118] sm:$0xff]   ;;  %v3149_v31 = vld [vmem:[#allocation6 + $0x1a0] sm:$0xff]  }
  0xc6   : > { %v350_v3 = vpop.permute.xlu1 %349  ;;  %248 = vst.msk [vmem:[#allocation2 + $0x54] sm:$0xff] %vm3851_vm14, %v241_v42  ;;  %v316_v14 = vpop.permute.xlu0 %315 }
  0xc7   : > { %v352_v6 = vrot.slane %v350_v3, 4  ;;  %280 = vst.msk [vmem:[#allocation2 + $0x58] sm:$0xff] %vm3855_vm15, %v273_v4  ;;  %v319_v7 = vrot.slane %v316_v14, 4 }
  0xc8   : > { %330 = vst.msk [vmem:[#allocation2 + $0x5c] sm:$0xff] %vm3866_vm6, %v323_v1 }
  0xc9   : > { %v355_v8 = vsel %vm353_vm7, %v352_v6, %v350_v3  ;;  %v322_v11 = vsel %vm321_vm0, %v319_v7, %v316_v14  ;;  %v3150_v3 = vld [vmem:[#allocation6 + $0x150] sm:$0xff]   ;;  %v3151_v6 = vld [vmem:[#allocation6 + $0x1d8] sm:$0xff]  }
  0xca   : > { %362 = vst.msk [vmem:[#allocation2 + $0x60] sm:$0xff] %vm3875_vm8, %v355_v8  ;;  %v400_v0 = vpop.permute.xlu1 %399  ;;  %v348_v59 = vpop.permute.xlu0 %347 }
  0xcb   : > { %329 = vst.msk [vmem:[#allocation2 + $0xc] sm:$0xff] %vm3866_vm6, %v322_v11  ;;  %v402_v15 = vrot.slane %v400_v0, 4  ;;  %v351_v18 = vrot.slane %v348_v59, 4 }
  0xcd   : > { %v405_v22 = vsel %vm403_vm10, %v402_v15, %v400_v0  ;;  %v3126_v25 = vld [vmem:[#allocation2 + $0x4] ss:$80 sps:$4 sm:$0xff]   ;;  %v354_v2 = vsel %vm353_vm7, %v351_v18, %v348_v59  ;;  %v3153_v15 = vld [vmem:[#allocation6 + $0x198] sm:$0xff]  }
  0xce   : > { %412 = vst.msk [vmem:[#allocation2 + $0x64] sm:$0xff] %vm3889_vm1, %v405_v22  ;;  %v432_v16 = vpop.permute.xlu1 %431  ;;  %v398_v27 = vpop.permute.xlu0 %397  ;;  %2113 = vmatprep.mubr.bf16.mxu0 %v3126_v25  ;;  %v3132_v38 = vld [vmem:[#allocation2 + $0x8] ss:$80 sps:$4 sm:$0xff]   ;;  %v3152_v0 = vld [vmem:[#allocation6 + $0x110] sm:$0xff]  }
  0xcf   : > { %361 = vst.msk [vmem:[#allocation2 + $0x10] sm:$0xff] %vm3875_vm8, %v354_v2  ;;  %v434_v24 = vrot.slane %v432_v16, 4  ;;  %v401_v32 = vrot.slane %v398_v27, 4  ;;  %2114 = vmatmul.mubr.bf16.vlgmr.msra.gmra.mxu0 %v3124_v23  ;;  %v3158_v22 = vld [vmem:[#allocation6 + $0x1d0] sm:$0xff]   ;;  %v3159_v2 = vld [vmem:[#allocation6 + $0x108] sm:$0xff]  }
  0xd0   : > { %2854 = vmatpush3.bf16.msra.mxu0 %v3130_v17 }
  0xd1   : > { %v437_v36 = vsel %vm435_vm3, %v434_v24, %v432_v16  ;;  %v404_v58 = vsel %vm403_vm10, %v401_v32, %v398_v27  ;;  %2855 = vmatprep.subr.bf16.mxu0 %v3135_v21  ;;  %v3160_v27 = vld [vmem:[#allocation6 + $0x190] sm:$0xff]  }
  0xd2   : > { %v3134_v20 = vld [vmem:[#allocation2 + $0xc] ss:$80 sps:$4 sm:$0xff]   ;;  %444 = vst.msk [vmem:[#allocation2 + $0x68] sm:$0xff] %vm3900_vm4, %v437_v36  ;;  %v476_v9 = vpop.permute.xlu1 %475  ;;  %v430_v39 = vpop.permute.xlu0 %429 }
  0xd3   : > { %411 = vst.msk [vmem:[#allocation2 + $0x14] sm:$0xff] %vm3889_vm1, %v404_v58  ;;  %v478_v44 = vrot.slane %v476_v9, 4  ;;  %2154 = vmatprep.mubr.bf16.mxu1 %v3134_v20  ;;  %v433_v45 = vrot.slane %v430_v39, 4  ;;  %v3164_v58 = vld [vmem:[#allocation6 + $0x188] sm:$0xff]  }
  0xd4   : > { %2155 = vmatmul.mubr.bf16.vlgmr.msra.gmra.mxu1 %v3132_v38  ;;  %2856 = vmatpush3.bf16.msra.mxu0 %v3136_v28  ;;  %v3161_v28 = vld [vmem:[#allocation6 + $0x140] sm:$0xff]  }
  0xd5   : > { %v481_v37 = vsel %vm479_vm11, %v478_v44, %v476_v9  ;;  %2876 = vmatpush3.bf16.msra.mxu1 %v3137_v29  ;;  %v436_v46 = vsel %vm435_vm3, %v433_v45, %v430_v39  ;;  %2857 = vmatprep.subr.bf16.mxu0 %v3138_v34  ;;  %v3163_v38 = vld [vmem:[#allocation6 + $0x100] sm:$0xff]  }
  0xd6   : > { %488 = vst.msk [vmem:[#allocation2 + $0x6c] sm:$0xff] %vm3912_vm2, %v481_v37  ;;  %v523_v48 = vpop.permute.xlu1 %522  ;;  %2877 = vmatprep.subr.bf16.mxu1 %v3139_v35  ;;  %v474_v49 = vpop.permute.xlu0 %473  ;;  %v3168_v9 = vld [vmem:[#allocation6 + $0x1c0] sm:$0xff]   ;;  %v3171_v37 = vld [vmem:[#allocation6 + $0x238] sm:$0xff]  }
  0xd7   : > { %443 = vst.msk [vmem:[#allocation2 + $0x18] sm:$0xff] %vm3900_vm4, %v436_v46  ;;  %v525_v50 = vrot.slane %v523_v48, 4  ;;  %v477_v41 = vrot.slane %v474_v49, 4 }
  0xd8   : > { %2858 = vmatpush3.bf16.msra.mxu0 %v3140_v10 }
  0xd9   : > { %v527_v55 = vsel %vm239_vm12, %v525_v50, %v523_v48  ;;  %2878 = vmatpush3.bf16.msra.mxu1 %v3141_v26  ;;  %v480_v56 = vsel %vm479_vm11, %v477_v41, %v474_v49  ;;  %2859 = vmatprep.subr.bf16.mxu0 %v3142_v19  ;;  %v3170_v26 = vld [vmem:[#allocation6 + $0x180] sm:$0xff]   ;;  %v3175_v48 = vld [vmem:[#allocation6 + $0x270] sm:$0xff]  }
  0xda   : > { %v3156_v54 = vld [vmem:[#allocation2 + $0x14] ss:$80 sps:$4 sm:$0xff]   ;;  %531 = vst.msk [vmem:[#allocation2 + $0x78] sm:$0xff] %vm3851_vm14, %v527_v55  ;;  %v548_v61 = vpop.permute.xlu1 %547  ;;  %2879 = vmatprep.subr.bf16.mxu1 %v3143_v13  ;;  %v521_v63 = vpop.permute.xlu0 %520  ;;  %v3154_v19 = vld [vmem:[#allocation2 + $0x10] ss:$80 sps:$4 sm:$0xff]  }
  0xdb   : > { %487 = vst.msk [vmem:[#allocation2 + $0x1c] sm:$0xff] %vm3912_vm2, %v480_v56  ;;  %v550_v33 = vrot.slane %v548_v61, 4  ;;  %2195 = vmatprep.mubr.bf16.mxu0 %v3156_v54  ;;  %v524_v42 = vrot.slane %v521_v63, 4  ;;  %v3174_v49 = vld [vmem:[#allocation2 + $0x24] ss:$80 sps:$4 sm:$0xff]   ;;  %v3178_v56 = vld [vmem:[#allocation6 + $0x2b8] sm:$0xff]  }
  0xdc   : > { %2860 = vmatpush3.bf16.msra.mxu0 %v3144_v52  ;;  %v3177_v55 = vld [vmem:[#allocation6 + $0x230] sm:$0xff]   ;;  %v3179_v54 = vld [vmem:[#allocation6 + $0x268] sm:$0xff]  }
  0xdd   : > { %v552_v1 = vsel %vm271_vm13, %v550_v33, %v548_v61  ;;  %2880 = vmatpush3.bf16.msra.mxu1 %v3145_v53  ;;  %v526_v4 = vsel %vm239_vm12, %v524_v42, %v521_v63  ;;  %2861 = vmatprep.subr.bf16.mxu0 %v3146_v60  ;;  %v3180_v63 = vld [vmem:[#allocation6 + $0x2f0] sm:$0xff]  }
  0xde   : > { %556 = vst.msk [vmem:[#allocation2 + $0x7c] sm:$0xff] %vm3855_vm15, %v552_v1  ;;  %v591_v14 = vpop.permute.xlu1 %590  ;;  %2881 = vmatprep.subr.bf16.mxu1 %v3147_v62  ;;  %v546_v7 = vpop.permute.xlu0 %545  ;;  %v3165_v62 = vld [vmem:[#allocation2 + $0x18] ss:$80 sps:$4 sm:$0xff]   ;;  %v3182_v42 = vld [vmem:[#allocation6 + $0x2b0] sm:$0xff]  }
  0xdf   : > { %530 = vst.msk [vmem:[#allocation2 + $0x28] sm:$0xff] %vm3851_vm14, %v526_v4  ;;  %v593_v8 = vrot.slane %v591_v14, 4  ;;  %v549_v11 = vrot.slane %v546_v7, 4 }
  0xe0   : > { %2862 = vmatpush3.bf16.msra.mxu0 %v3148_v30 }
  0xe1   : > { %v595_v59 = vsel %vm321_vm0, %v593_v8, %v591_v14  ;;  %2882 = vmatpush3.bf16.msra.mxu1 %v3149_v31  ;;  %v551_v18 = vsel %vm271_vm13, %v549_v11, %v546_v7  ;;  %2863 = vmatprep.subr.bf16.mxu0 %v3150_v3  ;;  %v3181_v31 = vld [vmem:[#allocation6 + $0x228] sm:$0xff]   ;;  %v3183_v3 = vld [vmem:[#allocation6 + $0x260] sm:$0xff]   ;;  %v3187_v7 = vld [vmem:[#allocation6 + $0x258] sm:$0xff]  }
  0xe2   : > { %v3167_v17 = vld [vmem:[#allocation2 + $0x1c] ss:$80 sps:$4 sm:$0xff]   ;;  %599 = vst.msk [vmem:[#allocation2 + $0x80] sm:$0xff] %vm3866_vm6, %v595_v59  ;;  %v616_v21 = vpop.permute.xlu1 %615  ;;  %2883 = vmatprep.subr.bf16.mxu1 %v3151_v6  ;;  %v589_v23 = vpop.permute.xlu0 %588  ;;  %v3188_v8 = vld [vmem:[#allocation6 + $0x2e0] sm:$0xff]   ;;  %v3191_v59 = vld [vmem:[#allocation6 + $0x250] sm:$0xff]  }
  0xe3   : > { %555 = vst.msk [vmem:[#allocation2 + $0x2c] sm:$0xff] %vm3855_vm15, %v551_v18  ;;  %v618_v25 = vrot.slane %v616_v21, 4  ;;  %2236 = vmatprep.mubr.bf16.mxu1 %v3167_v17  ;;  %v592_v16 = vrot.slane %v589_v23, 4  ;;  %v3184_v14 = vld [vmem:[#allocation6 + $0x2e8] sm:$0xff]   ;;  %v3189_v11 = vld [vmem:[#allocation6 + $0x218] sm:$0xff]  }
  0xe4   : > { %2864 = vmatpush3.bf16.msra.mxu0 %v3152_v0  ;;  %v3186_v6 = vld [vmem:[#allocation6 + $0x2a8] sm:$0xff]   ;;  %v3190_v0 = vld [vmem:[#allocation6 + $0x2a0] sm:$0xff]   ;;  %v3194_v17 = vld [vmem:[#allocation6 + $0x298] sm:$0xff]  }
  0xe5   : > { %v620_v24 = vsel %vm353_vm7, %v618_v25, %v616_v21  ;;  %2884 = vmatpush3.bf16.msra.mxu1 %v3153_v15  ;;  %v594_v29 = vsel %vm321_vm0, %v592_v16, %v589_v23  ;;  %2865 = vmatprep.subr.bf16.mxu0 %v3157_v57  ;;  %v3192_v15 = vld [vmem:[#allocation6 + $0x2d8] sm:$0xff]   ;;  %v3195_v18 = vld [vmem:[#allocation6 + $0x248] sm:$0xff]   ;;  %v3196_v21 = vld [vmem:[#allocation6 + $0x2d0] sm:$0xff]  }
  0xe6   : > { %624 = vst.msk [vmem:[#allocation2 + $0x84] sm:$0xff] %vm3875_vm8, %v620_v24  ;;  %v659_v32 = vpop.permute.xlu1 %658  ;;  %2885 = vmatprep.subr.bf16.mxu1 %v3158_v22  ;;  %v614_v34 = vpop.permute.xlu0 %613  ;;  %v3197_v57 = vld [vmem:[#allocation6 + $0x208] sm:$0xff]   ;;  %v3198_v22 = vld [vmem:[#allocation6 + $0x290] sm:$0xff]   ;;  %v3199_v23 = vld [vmem:[#allocation6 + $0x240] sm:$0xff]  }
  0xe7   : > { %598 = vst.msk [vmem:[#allocation2 + $0x30] sm:$0xff] %vm3866_vm6, %v594_v29  ;;  %v661_v35 = vrot.slane %v659_v32, 4  ;;  %v617_v36 = vrot.slane %v614_v34, 4  ;;  %v3200_v25 = vld [vmem:[#allocation6 + $0x2c8] sm:$0xff]   ;;  %v3207_v24 = vld [vmem:[#allocation6 + $0x378] sm:$0xff]  }
  0xe8   : > { %2866 = vmatpush3.bf16.msra.mxu0 %v3159_v2  ;;  %v3201_v2 = vld [vmem:[#allocation6 + $0x200] sm:$0xff]   ;;  %v3202_v16 = vld [vmem:[#allocation6 + $0x288] sm:$0xff]   ;;  %v3209_v29 = vld [vmem:[#allocation6 + $0x338] sm:$0xff]  }
  0xe9   : > { %v663_v20 = vsel %vm403_vm10, %v661_v35, %v659_v32  ;;  %2886 = vmatpush3.bf16.msra.mxu1 %v3160_v27  ;;  %v619_v39 = vsel %vm353_vm7, %v617_v36, %v614_v34  ;;  %2867 = vmatprep.subr.bf16.mxu0 %v3161_v28  ;;  %v3206_v27 = vld [vmem:[#allocation6 + $0x2c0] sm:$0xff]   ;;  %v3211_v34 = vld [vmem:[#allocation6 + $0x3f8] sm:$0xff]   ;;  %v3212_v36 = vld [vmem:[#allocation6 + $0x330] sm:$0xff]  }
  0xea   : > { %667 = vst.msk [vmem:[#allocation2 + $0x88] sm:$0xff] %vm3889_vm1, %v663_v20  ;;  %v684_v44 = vpop.permute.xlu1 %683  ;;  %2887 = vmatprep.subr.bf16.mxu1 %v3162_v51  ;;  %v657_v10 = vpop.permute.xlu0 %656  ;;  %v3205_v12 = vld [vmem:[#allocation2 + $0x2c] ss:$80 sps:$4 sm:$0xff]   ;;  %v3208_v28 = vld [vmem:[#allocation6 + $0x280] sm:$0xff]   ;;  %v3210_v51 = vld [vmem:[#allocation6 + $0x370] sm:$0xff]  }
  0xeb   : > { %623 = vst.msk [vmem:[#allocation2 + $0x34] sm:$0xff] %vm3875_vm8, %v619_v39  ;;  %v686_v45 = vrot.slane %v684_v44, 4  ;;  %v660_v46 = vrot.slane %v657_v10, 4  ;;  %v3172_v32 = vld [vmem:[#allocation2 + $0x20] ss:$80 sps:$4 sm:$0xff]  }
  0xec   : > { %2868 = vmatpush3.bf16.msra.mxu0 %v3163_v38  ;;  %v3213_v38 = vld [vmem:[#allocation6 + $0x3b8] sm:$0xff]  }
  0xed   : > { %v688_v13 = vsel %vm435_vm3, %v686_v45, %v684_v44  ;;  %2888 = vmatpush3.bf16.msra.mxu1 %v3164_v58  ;;  %v662_v50 = vsel %vm403_vm10, %v660_v46, %v657_v10  ;;  %2897 = vmatprep.subr.bf16.mxu0 %v3169_v43  ;;  %v3203_v20 = vld [vmem:[#allocation2 + $0x28] ss:$80 sps:$4 sm:$0xff]   ;;  %v3217_v43 = vld [vmem:[#allocation6 + $0x3b0] sm:$0xff]   ;;  %v3218_v10 = vld [vmem:[#allocation6 + $0x360] sm:$0xff]  }
  0xee   : > { %692 = vst.msk [vmem:[#allocation2 + $0x8c] sm:$0xff] %vm3900_vm4, %v688_v13  ;;  %v721_v52 = vpop.permute.xlu1 %720  ;;  %2889 = vmatprep.subr.bf16.mxu1 %v3168_v9  ;;  %v682_v41 = vpop.permute.xlu0 %681  ;;  %v3214_v58 = vld [vmem:[#allocation6 + $0x368] sm:$0xff]   ;;  %v3215_v9 = vld [vmem:[#allocation6 + $0x3f0] sm:$0xff]   ;;  %v3222_v46 = vld [vmem:[#allocation6 + $0x358] sm:$0xff]  }
  0xef   : > { %666 = vst.msk [vmem:[#allocation2 + $0x38] sm:$0xff] %vm3889_vm1, %v662_v50  ;;  %v723_v53 = vrot.slane %v721_v52, 4  ;;  %v685_v60 = vrot.slane %v682_v41, 4  ;;  %2196 = vmatmul.mubr.bf16.vlgmr.msra.gmra.mxu0 %v3154_v19  ;;  %v3216_v44 = vld [vmem:[#allocation6 + $0x328] sm:$0xff]   ;;  %v3223_v19 = vld [vmem:[#allocation6 + $0x3e0] sm:$0xff]   ;;  %v3227_v50 = vld [vmem:[#allocation6 + $0x3d8] sm:$0xff]  }
  0xf0   : > { %2898 = vmatpush3.bf16.msra.mxu0 %v3171_v37  ;;  %2277 = vmatprep.mubr.bf16.mxu0 %v3174_v49  ;;  %v3219_v45 = vld [vmem:[#allocation6 + $0x3e8] sm:$0xff]   ;;  %v3225_v13 = vld [vmem:[#allocation6 + $0x3a0] sm:$0xff]   ;;  %v3226_v49 = vld [vmem:[#allocation6 + $0x350] sm:$0xff]  }
  0xf1   : > { %v725_v61 = vsel %vm479_vm11, %v723_v53, %v721_v52  ;;  %2890 = vmatpush3.bf16.msra.mxu1 %v3170_v26  ;;  %v687_v33 = vsel %vm435_vm3, %v685_v60, %v682_v41  ;;  %2899 = vmatprep.subr.bf16.mxu0 %v3175_v48  ;;  %v3220_v26 = vld [vmem:[#allocation6 + $0x320] sm:$0xff]   ;;  %v3221_v37 = vld [vmem:[#allocation6 + $0x3a8] sm:$0xff]   ;;  %v3224_v48 = vld [vmem:[#allocation6 + $0x318] sm:$0xff]  }
  0xf2   : > { %729 = vst.msk [vmem:[#allocation2 + $0x90] sm:$0xff] %vm3912_vm2, %v725_v61  ;;  %v719_v30 = vpop.permute.xlu0 %718  ;;  %2919 = vmatprep.subr.bf16.mxu1 %v3176_v5  ;;  %v3232_v35 = vld [vmem:[#allocation2 + $0x34] ss:$80 sps:$4 sm:$0xff]   ;;  %v3229_v5 = vld [vmem:[#allocation6 + $0x398] sm:$0xff]   ;;  %v3233_v41 = vld [vmem:[#allocation6 + $0x348] sm:$0xff]  }
  0xf3   : > { %691 = vst.msk [vmem:[#allocation2 + $0x3c] sm:$0xff] %vm3900_vm4, %v687_v33  ;;  %v722_v1 = vrot.slane %v719_v30, 4  ;;  %v3228_v52 = vld [vmem:[#allocation6 + $0x310] sm:$0xff]   ;;  %v3237_v60 = vld [vmem:[#allocation6 + $0x340] sm:$0xff]   ;;  %v3245_v33 = vld [vmem:[#allocation6 + $0x478] sm:$0xff]  }
  0xf4   : > { %2237 = vmatmul.mubr.bf16.vlgmr.msra.gmra.mxu1 %v3165_v62  ;;  %2900 = vmatpush3.bf16.msra.mxu0 %v3177_v55  ;;  %v3234_v53 = vld [vmem:[#allocation6 + $0x3d0] sm:$0xff]   ;;  %v3235_v55 = vld [vmem:[#allocation6 + $0x308] sm:$0xff]   ;;  %v3239_v61 = vld [vmem:[#allocation6 + $0x300] sm:$0xff]  }
  0xf5   : > { %2920 = vmatpush3.bf16.msra.mxu1 %v3178_v56  ;;  %v724_v4 = vsel %vm479_vm11, %v722_v1, %v719_v30  ;;  %2901 = vmatprep.subr.bf16.mxu0 %v3179_v54  ;;  %v3236_v56 = vld [vmem:[#allocation6 + $0x390] sm:$0xff]   ;;  %v3238_v54 = vld [vmem:[#allocation6 + $0x3c8] sm:$0xff]   ;;  %v3247_v30 = vld [vmem:[#allocation6 + $0x438] sm:$0xff]  }
  0xf6   : > { %2921 = vmatprep.subr.bf16.mxu1 %v3180_v63  ;;  %728 = vst.msk [vmem:[#allocation2 + $0x40] sm:$0xff] %vm3912_vm2, %v724_v4  ;;  %2318 = vmatprep.mubr.bf16.mxu1 %v3205_v12  ;;  %v3240_v62 = vld [vmem:[#allocation6 + $0x388] sm:$0xff]   ;;  %v3244_v63 = vld [vmem:[#allocation6 + $0x3c0] sm:$0xff]   ;;  %v3250_v4 = vld [vmem:[#allocation6 + $0x4b8] sm:$0xff]  }
  0xf7   : > { %v3246_v12 = vld [vmem:[#allocation6 + $0x380] sm:$0xff]  }
  0xf8   : > { %2902 = vmatpush3.bf16.msra.mxu0 %v3181_v31  ;;  %v3230_v31 = vld [vmem:[#allocation2 + $0x30] ss:$80 sps:$4 sm:$0xff]  }
  0xf9   : > { %2922 = vmatpush3.bf16.msra.mxu1 %v3182_v42  ;;  %2903 = vmatprep.subr.bf16.mxu0 %v3183_v3  ;;  %v3248_v42 = vld [vmem:[#allocation6 + $0x470] sm:$0xff]  }
  0xfa   : > { %2923 = vmatprep.subr.bf16.mxu1 %v3184_v14  ;;  %v3243_v39 = vld [vmem:[#allocation2 + $0x3c] ss:$80 sps:$4 sm:$0xff]   ;;  %v3249_v3 = vld [vmem:[#allocation6 + $0x430] sm:$0xff]   ;;  %v3241_v14 = vld [vmem:[#allocation2 + $0x38] ss:$80 sps:$4 sm:$0xff]  }
  0xfc   : > { %2904 = vmatpush3.bf16.msra.mxu0 %v3185_v47  ;;  %v3430_v47 = vmov 0  }
  0xfd   : > { %2924 = vmatpush3.bf16.msra.mxu1 %v3186_v6  ;;  %2905 = vmatprep.subr.bf16.mxu0 %v3187_v7  ;;  %v3271_v1 = vld [vmem:[#allocation2 + $0x44] ss:$80 sps:$4 sm:$0xff]   ;;  %v3251_v6 = vld [vmem:[#allocation6 + $0x468] sm:$0xff]  }
  0xfe   : > { %2925 = vmatprep.subr.bf16.mxu1 %v3188_v8  ;;  %v3274_v7 = vld [vmem:[#allocation2 + $0x4c] ss:$80 sps:$4 sm:$0xff]  }
  0xff   : > { %v3252_v8 = vld [vmem:[#allocation6 + $0x428] sm:$0xff]  }
 0x100   : > { %2906 = vmatpush3.bf16.msra.mxu0 %v3189_v11  ;;  %v3253_v11 = vld [vmem:[#allocation6 + $0x4b0] sm:$0xff]  }
 0x101   : > { %2926 = vmatpush3.bf16.msra.mxu1 %v3190_v0  ;;  %2907 = vmatprep.subr.bf16.mxu0 %v3191_v59  ;;  %v3254_v0 = vld [vmem:[#allocation6 + $0x460] sm:$0xff]  }
 0x102   : > { %2927 = vmatprep.subr.bf16.mxu1 %v3192_v15  ;;  %v3255_v59 = vld [vmem:[#allocation6 + $0x420] sm:$0xff]   ;;  %v3256_v15 = vld [vmem:[#allocation6 + $0x4a8] sm:$0xff]  }
 0x104   : > { %2908 = vmatpush3.bf16.msra.mxu0 %v3193_v40  ;;  %v3257_v40 = vld [vmem:[#allocation6 + $0x458] sm:$0xff]  }
 0x105   : > { %2928 = vmatpush3.bf16.msra.mxu1 %v3194_v17  ;;  %2909 = vmatprep.subr.bf16.mxu0 %v3195_v18  ;;  %v3258_v17 = vld [vmem:[#allocation6 + $0x418] sm:$0xff]   ;;  %v3259_v18 = vld [vmem:[#allocation6 + $0x4a0] sm:$0xff]  }
 0x106   : > { %2929 = vmatprep.subr.bf16.mxu1 %v3196_v21  ;;  %v3260_v21 = vld [vmem:[#allocation6 + $0x450] sm:$0xff]  }
 0x108   : > { %2910 = vmatpush3.bf16.msra.mxu0 %v3197_v57  ;;  %v3261_v57 = vld [vmem:[#allocation6 + $0x410] sm:$0xff]  }
 0x109   : > { %2930 = vmatpush3.bf16.msra.mxu1 %v3198_v22  ;;  %2911 = vmatprep.subr.bf16.mxu0 %v3199_v23  ;;  %v3262_v22 = vld [vmem:[#allocation6 + $0x498] sm:$0xff]   ;;  %v3263_v23 = vld [vmem:[#allocation6 + $0x448] sm:$0xff]  }
 0x10a   : > { %2931 = vmatprep.subr.bf16.mxu1 %v3200_v25  ;;  %v3264_v25 = vld [vmem:[#allocation6 + $0x408] sm:$0xff]  }
 0x10c   : > { %2912 = vmatpush3.bf16.msra.mxu0 %v3201_v2  ;;  %v3265_v2 = vld [vmem:[#allocation6 + $0x490] sm:$0xff]  }
 0x10d   : > { %2932 = vmatpush3.bf16.msra.mxu1 %v3202_v16  ;;  %2941 = vmatprep.subr.bf16.mxu0 %v3207_v24  ;;  %v3266_v16 = vld [vmem:[#allocation6 + $0x440] sm:$0xff]   ;;  %v3268_v24 = vld [vmem:[#allocation6 + $0x488] sm:$0xff]  }
 0x10e   : > { %2933 = vmatprep.subr.bf16.mxu1 %v3206_v27  ;;  %v3267_v27 = vld [vmem:[#allocation6 + $0x400] sm:$0xff]  }
 0x10f   : > { %2278 = vmatmul.mubr.bf16.vlgmr.msra.gmra.mxu0 %v3172_v32  ;;  %v3273_v32 = vld [vmem:[#allocation6 + $0x4c0] sm:$0xff]  }
 0x110   : > { %2942 = vmatpush3.bf16.msra.mxu0 %v3209_v29  ;;  %2359 = vmatprep.mubr.bf16.mxu0 %v3232_v35  ;;  %v3272_v29 = vld [vmem:[#allocation6 + $0x480] sm:$0xff]  }
 0x111   : > { %2934 = vmatpush3.bf16.msra.mxu1 %v3208_v28  ;;  %2943 = vmatprep.subr.bf16.mxu0 %v3210_v51  ;;  %v3269_v28 = vld [vmem:[#allocation2 + $0x40] ss:$80 sps:$4 sm:$0xff]   ;;  %v3276_v51 = vld [vmem:[#allocation2 + $0x48] ss:$80 sps:$4 sm:$0xff]  }
 0x112   : > { %2963 = vmatprep.subr.bf16.mxu1 %v3211_v34 }
 0x114   : > { %2319 = vmatmul.mubr.bf16.vlgmr.msra.gmra.mxu1 %v3203_v20  ;;  %2944 = vmatpush3.bf16.msra.mxu0 %v3212_v36 }
 0x115   : > { %2964 = vmatpush3.bf16.msra.mxu1 %v3213_v38  ;;  %2945 = vmatprep.subr.bf16.mxu0 %v3214_v58 }
 0x116   : > { %2965 = vmatprep.subr.bf16.mxu1 %v3215_v9  ;;  %2400 = vmatprep.mubr.bf16.mxu1 %v3243_v39 }
 0x118   : > { %2946 = vmatpush3.bf16.msra.mxu0 %v3216_v44 }
 0x119   : > { %2966 = vmatpush3.bf16.msra.mxu1 %v3217_v43  ;;  %2947 = vmatprep.subr.bf16.mxu0 %v3218_v10 }
 0x11a   : > { %2967 = vmatprep.subr.bf16.mxu1 %v3219_v45 }
 0x11c   : > { %2948 = vmatpush3.bf16.msra.mxu0 %v3220_v26 }
 0x11d   : > { %2968 = vmatpush3.bf16.msra.mxu1 %v3221_v37  ;;  %2949 = vmatprep.subr.bf16.mxu0 %v3222_v46 }
 0x11e   : > { %2969 = vmatprep.subr.bf16.mxu1 %v3223_v19 }
 0x120   : > { %2950 = vmatpush3.bf16.msra.mxu0 %v3224_v48 }
 0x121   : > { %2970 = vmatpush3.bf16.msra.mxu1 %v3225_v13  ;;  %2951 = vmatprep.subr.bf16.mxu0 %v3226_v49 }
 0x122   : > { %2971 = vmatprep.subr.bf16.mxu1 %v3227_v50 }
 0x124   : > { %2952 = vmatpush3.bf16.msra.mxu0 %v3228_v52 }
 0x125   : > { %2972 = vmatpush3.bf16.msra.mxu1 %v3229_v5  ;;  %2953 = vmatprep.subr.bf16.mxu0 %v3233_v41 }
 0x126   : > { %2973 = vmatprep.subr.bf16.mxu1 %v3234_v53 }
 0x128   : > { %2954 = vmatpush3.bf16.msra.mxu0 %v3235_v55 }
 0x129   : > { %2974 = vmatpush3.bf16.msra.mxu1 %v3236_v56  ;;  %2955 = vmatprep.subr.bf16.mxu0 %v3237_v60 }
 0x12a   : > { %2975 = vmatprep.subr.bf16.mxu1 %v3238_v54 }
 0x12c   : > { %2956 = vmatpush3.bf16.msra.mxu0 %v3239_v61 }
 0x12d   : > { %2976 = vmatpush3.bf16.msra.mxu1 %v3240_v62  ;;  %2985 = vmatprep.subr.bf16.mxu0 %v3245_v33 }
 0x12e   : > { %2977 = vmatprep.subr.bf16.mxu1 %v3244_v63 }
 0x12f   : > { %2360 = vmatmul.mubr.bf16.vlgmr.msra.gmra.mxu0 %v3230_v31 }
 0x130   : > { %2986 = vmatpush3.bf16.msra.mxu0 %v3247_v30  ;;  %2441 = vmatprep.mubr.bf16.mxu0 %v3271_v1 }
 0x131   : > { %2978 = vmatpush3.bf16.msra.mxu1 %v3246_v12  ;;  %2987 = vmatprep.subr.bf16.mxu0 %v3248_v42 }
 0x132   : > { %2450 = vmatprep.subr.bf16.mxu1 %v3430_v47 }
 0x134   : > { %2401 = vmatmul.mubr.bf16.vlgmr.msra.gmra.mxu1 %v3241_v14  ;;  %2988 = vmatpush3.bf16.msra.mxu0 %v3249_v3 }
 0x135   : > { %2451 = vmatpush1.bf16.msra.mxu1 %v3250_v4  ;;  %2989 = vmatprep.subr.bf16.mxu0 %v3251_v6 }
 0x136   : > { %2452 = vmatprep.subr.bf16.mxu1 %v3430_v47  ;;  %2801 = vmatprep.mubr.msk.bf16.mxu1 %vm239_vm12, %v3274_v7 }
 0x138   : > { %2990 = vmatpush3.bf16.msra.mxu0 %v3252_v8 }
 0x139   : > { %2453 = vmatpush1.bf16.msra.mxu1 %v3253_v11  ;;  %2991 = vmatprep.subr.bf16.mxu0 %v3254_v0 }
 0x13a   : > { %2454 = vmatprep.subr.bf16.mxu1 %v3430_v47 }
 0x13c   : > { %2992 = vmatpush3.bf16.msra.mxu0 %v3255_v59 }
 0x13d   : > { %2455 = vmatpush1.bf16.msra.mxu1 %v3256_v15  ;;  %2993 = vmatprep.subr.bf16.mxu0 %v3257_v40 }
 0x13e   : > { %2456 = vmatprep.subr.bf16.mxu1 %v3430_v47 }
 0x140   : > { %2994 = vmatpush3.bf16.msra.mxu0 %v3258_v17 }
 0x141   : > { %2457 = vmatpush1.bf16.msra.mxu1 %v3259_v18  ;;  %2995 = vmatprep.subr.bf16.mxu0 %v3260_v21 }
 0x142   : > { %2458 = vmatprep.subr.bf16.mxu1 %v3430_v47 }
 0x144   : > { %2996 = vmatpush3.bf16.msra.mxu0 %v3261_v57 }
 0x145   : > { %2459 = vmatpush1.bf16.msra.mxu1 %v3262_v22  ;;  %2997 = vmatprep.subr.bf16.mxu0 %v3263_v23 }
 0x146   : > { %2460 = vmatprep.subr.bf16.mxu1 %v3430_v47 }
 0x148   : > { %2998 = vmatpush3.bf16.msra.mxu0 %v3264_v25 }
 0x149   : > { %2461 = vmatpush1.bf16.msra.mxu1 %v3265_v2  ;;  %2999 = vmatprep.subr.bf16.mxu0 %v3266_v16 }
 0x14a   : > { %2462 = vmatprep.subr.bf16.mxu1 %v3430_v47 }
 0x14c   : > { %3000 = vmatpush3.bf16.msra.mxu0 %v3267_v27 }
 0x14d   : > { %2463 = vmatpush1.bf16.msra.mxu1 %v3268_v24 }
 0x14e   : > { %2464 = vmatprep.subr.bf16.mxu1 %v3430_v47 }
 0x14f   : > { %2442 = vmatmul.mubr.bf16.vlgmr.msra.gmra.mxu0 %v3269_v28 }
 0x151   : > { %2465 = vmatpush1.bf16.msra.mxu1 %v3272_v29 }
 0x152   : > { %2480 = vmatprep.subr.bf16.mxu1 %v3430_v47 }
 0x155   : > { %2481 = vmatpush2.bf16.msra.mxu1 %v3273_v32 }
 0x158   : > { %2483 = vmatmul.mubr.bf16.vlgmr.msra.gmra.mxu1 %v3276_v51 }
 0x18f   : > { %v2825_v34 = vpop.f32.mrf.mxu0 }
 0x191   : > { %v2826_v35 = vpop.f32.mrf.mxu0 }
 0x192   : > { %v2827_v61 = vadd.f32 %v2826_v35, %v2825_v34 }
 0x193   : > { %v2828_v38 = vpop.f32.mrf.mxu0 }
 0x194   : > { %v2847_v36 = vpop.f32.mrf.mxu1 }
 0x195   : > { %v2829_v58 = vpop.f32.mrf.mxu0 }
 0x196   : > { %v2848_v20 = vpop.f32.mrf.mxu1  ;;  %v2830_v42 = vadd.f32 %v2829_v58, %v2828_v38 }
 0x197   : > { %v2849_v56 = vadd.f32 %v2848_v20, %v2847_v36 }
 0x198   : > { %v2850_v9 = vpop.f32.mrf.mxu1 }
 0x199   : > { %v2157_v63 = vadd.f32 %v2849_v56, %v2827_v61 }
 0x19a   : > { %v2851_v44 = vpop.f32.mrf.mxu1 }
 0x19b   : > { %v2852_v33 = vadd.f32 %v2851_v44, %v2850_v9 }
 0x19d   : > { %v2160_v14 = vadd.f32 %v2852_v33, %v2830_v42 }
 0x1af   : > { %v2869_v39 = vpop.f32.mrf.mxu0 }
 0x1b1   : > { %v2870_v43 = vpop.f32.mrf.mxu0 }
 0x1b2   : > { %v2871_v62 = vadd.f32 %v2870_v43, %v2869_v39 }
 0x1b3   : > { %v2872_v45 = vpop.f32.mrf.mxu0 }
 0x1b4   : > { %v2891_v10 = vpop.f32.mrf.mxu1  ;;  %v2198_v1 = vadd.f32 %v2871_v62, %v2157_v63 }
 0x1b5   : > { %v2873_v37 = vpop.f32.mrf.mxu0 }
 0x1b6   : > { %v2892_v26 = vpop.f32.mrf.mxu1  ;;  %v2874_v3 = vadd.f32 %v2873_v37, %v2872_v45 }
 0x1b7   : > { %v2893_v12 = vadd.f32 %v2892_v26, %v2891_v10 }
 0x1b8   : > { %v2894_v46 = vpop.f32.mrf.mxu1  ;;  %v2201_v0 = vadd.f32 %v2874_v3, %v2160_v14 }
 0x1b9   : > { %v2239_v47 = vadd.f32 %v2893_v12, %v2198_v1 }
 0x1ba   : > { %v2895_v48 = vpop.f32.mrf.mxu1 }
 0x1bb   : > { %v2896_v6 = vadd.f32 %v2895_v48, %v2894_v46 }
 0x1bd   : > { %v2242_v18 = vadd.f32 %v2896_v6, %v2201_v0 }
 0x1cf   : > { %v2913_v19 = vpop.f32.mrf.mxu0 }
 0x1d1   : > { %v2914_v13 = vpop.f32.mrf.mxu0 }
 0x1d2   : > { %v2915_v4 = vadd.f32 %v2914_v13, %v2913_v19 }
 0x1d3   : > { %v2916_v50 = vpop.f32.mrf.mxu0 }
 0x1d4   : > { %v2935_v49 = vpop.f32.mrf.mxu1  ;;  %v2280_v59 = vadd.f32 %v2915_v4, %v2239_v47 }
 0x1d5   : > { %v2917_v5 = vpop.f32.mrf.mxu0 }
 0x1d6   : > { %v2936_v52 = vpop.f32.mrf.mxu1  ;;  %v2918_v15 = vadd.f32 %v2917_v5, %v2916_v50 }
 0x1d7   : > { %v2937_v7 = vadd.f32 %v2936_v52, %v2935_v49 }
 0x1d8   : > { %v2938_v41 = vpop.f32.mrf.mxu1  ;;  %v2283_v2 = vadd.f32 %v2918_v15, %v2242_v18 }
 0x1d9   : > { %v2321_v21 = vadd.f32 %v2937_v7, %v2280_v59 }
 0x1da   : > { %v2939_v55 = vpop.f32.mrf.mxu1 }
 0x1db   : > { %v2940_v57 = vadd.f32 %v2939_v55, %v2938_v41 }
 0x1dd   : > { %v2324_v29 = vadd.f32 %v2940_v57, %v2283_v2 }
 0x1ef   : > { %v2957_v53 = vpop.f32.mrf.mxu0 }
 0x1f1   : > { %v2958_v60 = vpop.f32.mrf.mxu0 }
 0x1f2   : > { %v2959_v40 = vadd.f32 %v2958_v60, %v2957_v53 }
 0x1f3   : > { %v2960_v30 = vpop.f32.mrf.mxu0 }
 0x1f4   : > { %v2979_v54 = vpop.f32.mrf.mxu1  ;;  %v2362_v16 = vadd.f32 %v2959_v40, %v2321_v21 }
 0x1f5   : > { %v2961_v8 = vpop.f32.mrf.mxu0 }
 0x1f6   : > { %v2980_v31 = vpop.f32.mrf.mxu1  ;;  %v2962_v27 = vadd.f32 %v2961_v8, %v2960_v30 }
 0x1f7   : > { %v2981_v22 = vadd.f32 %v2980_v31, %v2979_v54 }
 0x1f8   : > { %v2982_v11 = vpop.f32.mrf.mxu1  ;;  %v2365_v35 = vadd.f32 %v2962_v27, %v2324_v29 }
 0x1f9   : > { %v2403_v32 = vadd.f32 %v2981_v22, %v2362_v16 }
 0x1fa   : > { %v2983_v23 = vpop.f32.mrf.mxu1 }
 0x1fb   : > { %v2984_v51 = vadd.f32 %v2983_v23, %v2982_v11 }
 0x1fd   : > { %v2406_v58 = vadd.f32 %v2984_v51, %v2365_v35 }
 0x20f   : > { %v3001_v17 = vpop.f32.mrf.mxu0 }
 0x211   : > { %v3002_v25 = vpop.f32.mrf.mxu0 }
 0x212   : > { %v3003_v24 = vadd.f32 %v3002_v25, %v3001_v17 }
 0x213   : > { %v3004_v28 = vpop.f32.mrf.mxu0 }
 0x214   : > { %v2444_v38 = vadd.f32 %v3003_v24, %v2403_v32 }
 0x215   : > { %v3005_v34 = vpop.f32.mrf.mxu0 }
 0x216   : > { %v3006_v36 = vadd.f32 %v3005_v34, %v3004_v28 }
 0x218   : > { %v2484_v20 = vpop.f32.mrf.mxu1  ;;  %v2447_v43 = vadd.f32 %v3006_v36, %v2406_v58 }
 0x219   : > { %v2485_v9 = vadd.f32 %v2484_v20, %v2444_v38 }
 0x21a   : > { %v2486_v39 = vpop.f32.mrf.mxu1 }
 0x21b   : > { %v2491_v44 = vmax.f32 %v2485_v9, 0.0 }
 0x21c   : > { %v2487_v10 = vpop.f32.mrf.mxu1 }
 0x21d   : > { %v2493_v45 = vmin.f32 %v2491_v44, 1.0  ;;  %v2488_v26 = vadd.f32 %v2487_v10, %v2447_v43 }
 0x21e   : > { %v2489_v37 = vpop.f32.mrf.mxu1 }
 0x21f   : > { %2495 = vst [vmem:[%s194_s29] sm:$0xff] %v2493_v45  ;;  %v2492_v46 = vmax.f32 %v2488_v26, 0.0 }
 0x221   : > { %v2494_v19 = vmin.f32 %v2492_v46, 1.0 }
 0x223   : > { %2496 = vst [vmem:[%s194_s29 + $0x8] sm:$0xff] %v2494_v19 }
 0x224   : > { %3344 = shalt.err (!%p3341_p3)
}
 0x225   : > { %s3345_s19 = scalar_lea.hbm %s3975_s8, 256  ;;  %s3349_s26 = scalar_lea.hbm %s4024_s2, 768 }
 0x226   : > { %p3346_p5 = scmp.ne.s32.totalorder %s3975_s8, %s3345_s19  ;;  %p3350_p6 = scmp.lt.s32.totalorder %s3975_s8, %s4024_s2 }
 0x227   : > { %p3351_p11 = scmp.lt.s32.totalorder %s3349_s26, %s3345_s19 }
 0x228   : > { %p3347_p7 = pnand %p3346_p5, %p4065_p4 }
 0x229   : > { %p3352_p10 = por %p3351_p11, %p3350_p6 }
 0x22a   : > { %p3348_p9 = pneg %p3347_p7 }
 0x22c   : > { %p3353_p1 = pnand %p3352_p10, %p3348_p9 }
 0x22e   : > { %3356 = shalt.err (!%p3353_p1)
}
 0x22f   : > { %s3432_s28 = smov 128   ;;  %s3433_s29 = smov 8  }
 0x230   : > { %3013 = dma.vmem_to_hbm [thread:$0]  (%p4065_p4), %s3970_s30, 256, %s3975_s8, %s2498_s16, %s3432_s28, %s3432_s28, %s3433_s29  }
 0x231 PF: > { %p3030_p8 = scmp.ge.s32.totalorder %s3415_s14, 2  ;;  %s2527_s3 = sand.u32 1, %s3395_s9  }
 0x232   : > { %p4066_p12 = scmp.ne.s32.totalorder %s4029_s20, 0  ;;  %s2528_s6 = scalar_lea.sflag [#allocation5], %s2527_s3 }
 0x234   : > { %p3024_p13 = pnand %p3030_p8, %p4066_p12 }
 0x236   : > { %p3025_p0 = pneg %p3024_p13 }
 0x238   : > { %3390 = dma.done.wait (%p3025_p0), %s2528_s6, 256  }
 0x239   : > { %3392 = vsyncadd (%p3025_p0), %s2528_s6, 4294967040  ;;  %s19_s14 = sadd.s32 1, %s3415_s14   ;;  %s4067_s9 = smov %s3399_s10 }
 0x23a   : > { %p16_p2 = scmp.ge.s32.totalorder %s19_s14, 5   ;;  %s4068_s10 = smov %s3403_s11 }
 0x23b   : > { %s4069_s11 = smov %s3544_s15  ;;  %s4070_s12 = smov %s3411_s13 }
 0x23c   : > { %s4071_s13 = smov %s4073_s25  ;;  %18 = sbr.rel (!%p16_p2) target bundleno = 7 (0x7), region = 77 }
 0x241   :  { %2533 = vsyncpa [#allocation4], 1 }
 0x242   :  { %2535 = vsyncpa [#allocation4 + $0x1], 1 }
 0x243   :  { %2536 = vsyncpa [#allocation7], 1 }
 0x244   :  { %2537 = vsyncpa [#allocation5], 1 }
 0x245   :  { %2539 = vsyncpa [#allocation5 + $0x1], 1 }

</bundles_post_ra>
